<compile_context>
chip_gen: v5e
topology: v5e:2x2
jax: 0.10.0
libtpu: 0.0.40
codegen_flags: <defaults>
</compile_context>

<pallas_src>
import jax
import jax.numpy as jnp
from jax.experimental import pallas as pl
from jax.experimental.pallas import tpu as pltpu


def _round_up(n, m):
    return ((n + m - 1) // m) * m


def _disc_kernel(x_ref, lbl_ref, w1_ref, b1_ref, w2_ref, b2_ref,
                 w3_ref, b3_ref, w4_ref, b4_ref, o_ref):
    f32 = jnp.float32
    bf16 = jnp.bfloat16
    # Layer 1: (TB, Dp) @ (Dp, 512), bf16 operands, f32 accumulation.
    h = jnp.dot(x_ref[...], w1_ref[...], preferred_element_type=f32)
    h = h + lbl_ref[...].astype(f32) + b1_ref[...]      # gathered label rows
    h = jnp.maximum(h, 0.0)
    # Layer 2: (TB, 512) @ (512, 256)
    h = jnp.dot(h.astype(bf16), w2_ref[...], preferred_element_type=f32)
    h = jnp.maximum(h + b2_ref[...], 0.0)
    # Layer 3: (TB, 256) @ (256, 128)
    h = jnp.dot(h.astype(bf16), w3_ref[...], preferred_element_type=f32)
    h = jnp.maximum(h + b3_ref[...], 0.0)
    # Layer 4 (128 -> 1): VPU multiply + XLU lane reduce; no N=1 MXU matmul.
    logit = jnp.sum(h * w4_ref[...], axis=-1, keepdims=True) + b4_ref[...]
    sig = jax.nn.sigmoid(logit)                          # EUP exp path
    # Lane-dense store: broadcast across the 128-wide output block.
    o_ref[...] = jnp.broadcast_to(sig, o_ref.shape)


def discriminator_forward(x, y, params, num_classes):
    """x: (B, C, H, W) float32, y: (B,) int32 labels -> (B, 1) float32."""
    B = x.shape[0]
    x_flat = x.reshape(B, -1)
    img_dim = x_flat.shape[1]
    w1, b1, w2, b2, w3, b3, w4, b4 = params

    # ---- wrapper-side layout plumbing (pure JAX) ----------------------------
    # Split w1 into image/label parts; the label contribution is a row gather
    # (replaces the one-hot @ w1_label matmul and the feats concat roundtrip).
    d_pad = _round_up(img_dim, 128)
    w1_img = jnp.zeros((d_pad, w1.shape[1]), jnp.bfloat16)
    w1_img = w1_img.at[:img_dim].set(w1[:img_dim].astype(jnp.bfloat16))
    w1_lbl = w1[img_dim:img_dim + num_classes]                   # (num_classes, 512)
    lbl_rows = jnp.take(w1_lbl, y, axis=0).astype(jnp.bfloat16)  # (B, 512)

    # Batch tiling: multiple of 16 rows (bf16 sublane packing), up to 256.
    tb = min(256, _round_up(B, 16))
    b_pad = _round_up(B, tb)
    nb = b_pad // tb

    x_p = jnp.zeros((b_pad, d_pad), jnp.bfloat16)
    x_p = x_p.at[:B, :img_dim].set(x_flat.astype(jnp.bfloat16))
    lbl_p = jnp.zeros((b_pad, lbl_rows.shape[1]), jnp.bfloat16).at[:B].set(lbl_rows)

    w2b = w2.astype(jnp.bfloat16)
    w3b = w3.astype(jnp.bfloat16)
    w4_row = w4.reshape(1, -1).astype(jnp.float32)   # (1, 128), VPU path stays f32

    def resident(arr):
        shape = arr.shape
        return pl.BlockSpec(shape, lambda i: (0,) * len(shape))

    out = pl.pallas_call(
        _disc_kernel,
        out_shape=jax.ShapeDtypeStruct((b_pad, 128), jnp.float32),
        grid=(nb,),
        in_specs=[
            pl.BlockSpec((tb, d_pad), lambda i: (i, 0)),
            pl.BlockSpec((tb, lbl_p.shape[1]), lambda i: (i, 0)),
            resident(w1_img), resident(b1),
            resident(w2b), resident(b2),
            resident(w3b), resident(b3),
            resident(w4_row), resident(b4),
        ],
        out_specs=pl.BlockSpec((tb, 128), lambda i: (i, 0)),
        compiler_params=pltpu.CompilerParams(
            dimension_semantics=("parallel",)),
    )(x_p, lbl_p, w1_img, b1, w2b, b2, w3b, b3, w4_row, b4)

    return out[:B, :1]


def init_params(key, img_dim, num_classes):
    """Deterministic init matching the nn.Linear shapes of the module."""
    D = img_dim + num_classes
    dims = [D, 512, 256, 128, 1]
    params = []
    for i in range(4):
        key, kw, kb = jax.random.split(key, 3)
        fan_in = dims[i]
        bound = 1.0 / float(fan_in) ** 0.5
        w = jax.random.uniform(kw, (dims[i], dims[i + 1]), jnp.float32, -bound, bound)
        b = jax.random.uniform(kb, (1, dims[i + 1]), jnp.float32, -bound, bound)
        params += [w, b]
    return tuple(params)


if __name__ == "__main__":
    # Small shapes consistent with the module.
    img_shape = (1, 12, 12)   # img_dim = 144 -> padded to 256 inside the wrapper
    num_classes = 10
    B = 32
    img_dim = 1
    for d in img_shape:
        img_dim *= d

    key = jax.random.PRNGKey(0)
    kx, ky, kp = jax.random.split(key, 3)
    x = jax.random.normal(kx, (B,) + img_shape, dtype=jnp.float32)
    y = jax.random.randint(ky, (B,), 0, num_classes, dtype=jnp.int32)
    params = init_params(kp, img_dim, num_classes)

    out = discriminator_forward(x, y, params, num_classes)
    out = jax.block_until_ready(out)
    assert out.shape == (B, 1)

    # ---- references ---------------------------------------------------------
    w1, b1, w2, b2, w3, b3, w4, b4 = params
    y_oh = jax.nn.one_hot(y, num_classes, dtype=jnp.float32)
    xf = x.reshape(B, -1)

    # (a) bf16-matched reference (same operand rounding the kernel applies).
    def rnd(a):
        return a.astype(jnp.bfloat16).astype(jnp.float32)
    h = jnp.maximum(jnp.concatenate([rnd(xf), y_oh], 1) @ rnd(w1) + b1, 0.0)
    h = jnp.maximum(rnd(h) @ rnd(w2) + b2, 0.0)
    h = jnp.maximum(rnd(h) @ rnd(w3) + b3, 0.0)
    ref_matched = jax.nn.sigmoid(h @ w4 + b4)
    assert jnp.allclose(out, ref_matched, atol=2e-3, rtol=2e-3)

    # (b) full-f32 module reference (loose tolerance for bf16 MXU operands).
    h = jnp.maximum(jnp.concatenate([xf, y_oh], 1) @ w1 + b1, 0.0)
    h = jnp.maximum(h @ w2 + b2, 0.0)
    h = jnp.maximum(h @ w3 + b3, 0.0)
    ref_f32 = jax.nn.sigmoid(h @ w4 + b4)
    assert jnp.allclose(out, ref_f32, atol=5e-2)

    print("KERNEL_OK")
</pallas_src>

<mosaic_0001>
module attributes {stable_mosaic.version = 11 : i64} {
  func.func @_disc_kernel(%arg0: i32, %arg1: memref<32x256xbf16, #tpu.memory_space<vmem>>, %arg2: memref<32x512xbf16, #tpu.memory_space<vmem>>, %arg3: memref<256x512xbf16, #tpu.memory_space<vmem>>, %arg4: memref<1x512xf32, #tpu.memory_space<vmem>>, %arg5: memref<512x256xbf16, #tpu.memory_space<vmem>>, %arg6: memref<1x256xf32, #tpu.memory_space<vmem>>, %arg7: memref<256x128xbf16, #tpu.memory_space<vmem>>, %arg8: memref<1x128xf32, #tpu.memory_space<vmem>>, %arg9: memref<1x128xf32, #tpu.memory_space<vmem>>, %arg10: memref<1x1xf32, #tpu.memory_space<vmem>>, %arg11: memref<32x128xf32, #tpu.memory_space<vmem>>) attributes {dimension_semantics = [#tpu.dimension_semantics<parallel>], iteration_bounds = array<i64: 1>, scalar_prefetch = 0 : i64, scratch_operands = 0 : i64, tpu.core_type = #tpu.core_type<tc>, window_params = [{transform_indices = @transform_0, window_bounds = array<i64: 32, 256>}, {transform_indices = @transform_1, window_bounds = array<i64: 32, 512>}, {pipeline_mode = #tpu.pipeline_mode<synchronous>, transform_indices = @transform_2, window_bounds = array<i64: 256, 512>}, {pipeline_mode = #tpu.pipeline_mode<synchronous>, transform_indices = @transform_3, window_bounds = array<i64: 1, 512>}, {pipeline_mode = #tpu.pipeline_mode<synchronous>, transform_indices = @transform_4, window_bounds = array<i64: 512, 256>}, {pipeline_mode = #tpu.pipeline_mode<synchronous>, transform_indices = @transform_5, window_bounds = array<i64: 1, 256>}, {pipeline_mode = #tpu.pipeline_mode<synchronous>, transform_indices = @transform_6, window_bounds = array<i64: 256, 128>}, {pipeline_mode = #tpu.pipeline_mode<synchronous>, transform_indices = @transform_7, window_bounds = array<i64: 1, 128>}, {pipeline_mode = #tpu.pipeline_mode<synchronous>, transform_indices = @transform_8, window_bounds = array<i64: 1, 128>}, {pipeline_mode = #tpu.pipeline_mode<synchronous>, transform_indices = @transform_9, window_bounds = array<i64: 1, 1>}, {transform_indices = @transform_10, window_bounds = array<i64: 32, 128>}]} {
    %c0 = arith.constant 0 : index
    %c0_0 = arith.constant 0 : index
    %0 = vector.load %arg1[%c0, %c0_0] : memref<32x256xbf16, #tpu.memory_space<vmem>>, vector<32x256xbf16>
    %c0_1 = arith.constant 0 : index
    %c0_2 = arith.constant 0 : index
    %1 = vector.load %arg3[%c0_1, %c0_2] : memref<256x512xbf16, #tpu.memory_space<vmem>>, vector<256x512xbf16>
    %cst = arith.constant dense<0.000000e+00> : vector<32x512xf32>
    %2 = tpu.matmul %0, %1, %cst {dimension_numbers = #tpu.dot_dimension_numbers<[1], [0], [0], [1], [0, 0, 1, 1], [], []>} : vector<32x256xbf16>, vector<256x512xbf16>, vector<32x512xf32> -> vector<32x512xf32>
    %c0_3 = arith.constant 0 : index
    %c0_4 = arith.constant 0 : index
    %3 = vector.load %arg2[%c0_3, %c0_4] : memref<32x512xbf16, #tpu.memory_space<vmem>>, vector<32x512xbf16>
    %4 = arith.extf %3 : vector<32x512xbf16> to vector<32x512xf32>
    %5 = arith.addf %2, %4 : vector<32x512xf32>
    %c0_5 = arith.constant 0 : index
    %c0_6 = arith.constant 0 : index
    %6 = vector.load %arg4[%c0_5, %c0_6] : memref<1x512xf32, #tpu.memory_space<vmem>>, vector<1x512xf32>
    %7 = vector.broadcast %6 : vector<1x512xf32> to vector<32x512xf32>
    %8 = arith.addf %5, %7 : vector<32x512xf32>
    %cst_7 = arith.constant 0.000000e+00 : f32
    %9 = vector.broadcast %cst_7 : f32 to vector<32x512xf32>
    %10 = arith.maximumf %8, %9 : vector<32x512xf32>
    %11 = arith.truncf %10 : vector<32x512xf32> to vector<32x512xbf16>
    %c0_8 = arith.constant 0 : index
    %c0_9 = arith.constant 0 : index
    %12 = vector.load %arg5[%c0_8, %c0_9] : memref<512x256xbf16, #tpu.memory_space<vmem>>, vector<512x256xbf16>
    %cst_10 = arith.constant dense<0.000000e+00> : vector<32x256xf32>
    %13 = tpu.matmul %11, %12, %cst_10 {dimension_numbers = #tpu.dot_dimension_numbers<[1], [0], [0], [1], [0, 0, 1, 1], [], []>} : vector<32x512xbf16>, vector<512x256xbf16>, vector<32x256xf32> -> vector<32x256xf32>
    %c0_11 = arith.constant 0 : index
    %c0_12 = arith.constant 0 : index
    %14 = vector.load %arg6[%c0_11, %c0_12] : memref<1x256xf32, #tpu.memory_space<vmem>>, vector<1x256xf32>
    %15 = vector.broadcast %14 : vector<1x256xf32> to vector<32x256xf32>
    %16 = arith.addf %13, %15 : vector<32x256xf32>
    %cst_13 = arith.constant 0.000000e+00 : f32
    %17 = vector.broadcast %cst_13 : f32 to vector<32x256xf32>
    %18 = arith.maximumf %16, %17 : vector<32x256xf32>
    %19 = arith.truncf %18 : vector<32x256xf32> to vector<32x256xbf16>
    %c0_14 = arith.constant 0 : index
    %c0_15 = arith.constant 0 : index
    %20 = vector.load %arg7[%c0_14, %c0_15] : memref<256x128xbf16, #tpu.memory_space<vmem>>, vector<256x128xbf16>
    %cst_16 = arith.constant dense<0.000000e+00> : vector<32x128xf32>
    %21 = tpu.matmul %19, %20, %cst_16 {dimension_numbers = #tpu.dot_dimension_numbers<[1], [0], [0], [1], [0, 0, 1, 1], [], []>} : vector<32x256xbf16>, vector<256x128xbf16>, vector<32x128xf32> -> vector<32x128xf32>
    %c0_17 = arith.constant 0 : index
    %c0_18 = arith.constant 0 : index
    %22 = vector.load %arg8[%c0_17, %c0_18] : memref<1x128xf32, #tpu.memory_space<vmem>>, vector<1x128xf32>
    %23 = vector.broadcast %22 : vector<1x128xf32> to vector<32x128xf32>
    %24 = arith.addf %21, %23 : vector<32x128xf32>
    %cst_19 = arith.constant 0.000000e+00 : f32
    %25 = vector.broadcast %cst_19 : f32 to vector<32x128xf32>
    %26 = arith.maximumf %24, %25 : vector<32x128xf32>
    %c0_20 = arith.constant 0 : index
    %c0_21 = arith.constant 0 : index
    %27 = vector.load %arg9[%c0_20, %c0_21] : memref<1x128xf32, #tpu.memory_space<vmem>>, vector<1x128xf32>
    %28 = vector.broadcast %27 : vector<1x128xf32> to vector<32x128xf32>
    %29 = arith.mulf %26, %28 : vector<32x128xf32>
    %cst_22 = arith.constant dense<0.000000e+00> : vector<32xf32>
    %30 = vector.multi_reduction <add>, %29, %cst_22 [1] : vector<32x128xf32> to vector<32xf32>
    %31 = vector.shape_cast %30 : vector<32xf32> to vector<32x1xf32>
    %c0_23 = arith.constant 0 : index
    %c0_24 = arith.constant 0 : index
    %32 = vector.load %arg10[%c0_23, %c0_24] : memref<1x1xf32, #tpu.memory_space<vmem>>, vector<1x1xf32>
    %33 = vector.broadcast %32 : vector<1x1xf32> to vector<32x1xf32>
    %34 = arith.addf %31, %33 : vector<32x1xf32>
    %35 = arith.negf %34 : vector<32x1xf32>
    %36 = math.exp %35 : vector<32x1xf32>
    %cst_25 = arith.constant 1.000000e+00 : f32
    %37 = vector.broadcast %cst_25 : f32 to vector<32x1xf32>
    %38 = arith.addf %37, %36 : vector<32x1xf32>
    %39 = arith.divf %37, %38 : vector<32x1xf32>
    %40 = vector.shape_cast %39 : vector<32x1xf32> to vector<32x1xf32>
    %41 = vector.broadcast %40 : vector<32x1xf32> to vector<32x128xf32>
    %c0_26 = arith.constant 0 : index
    %c0_27 = arith.constant 0 : index
    %42 = vector.load %arg11[%c0_26, %c0_27] : memref<32x128xf32, #tpu.memory_space<vmem>>, vector<32x128xf32>
    tpu.vector_store %arg11[%c0_26, %c0_27], %41 {strides = array<i32>} : memref<32x128xf32, #tpu.memory_space<vmem>>, vector<32x128xf32>,
    return
  }
  func.func @transform_0(%arg0: i32) -> (i32, i32) {
    %c0_i32 = arith.constant 0 : i32
    %c0_i32_0 = arith.constant 0 : i32
    return %arg0, %c0_i32 : i32, i32
  }
  func.func @transform_1(%arg0: i32) -> (i32, i32) {
    %c0_i32 = arith.constant 0 : i32
    %c0_i32_0 = arith.constant 0 : i32
    return %arg0, %c0_i32 : i32, i32
  }
  func.func @transform_2(%arg0: i32) -> (i32, i32) {
    %c0_i32 = arith.constant 0 : i32
    %c0_i32_0 = arith.constant 0 : i32
    %c0_i32_1 = arith.constant 0 : i32
    return %c0_i32, %c0_i32_0 : i32, i32
  }
  func.func @transform_3(%arg0: i32) -> (i32, i32) {
    %c0_i32 = arith.constant 0 : i32
    %c0_i32_0 = arith.constant 0 : i32
    %c0_i32_1 = arith.constant 0 : i32
    return %c0_i32, %c0_i32_0 : i32, i32
  }
  func.func @transform_4(%arg0: i32) -> (i32, i32) {
    %c0_i32 = arith.constant 0 : i32
    %c0_i32_0 = arith.constant 0 : i32
    %c0_i32_1 = arith.constant 0 : i32
    return %c0_i32, %c0_i32_0 : i32, i32
  }
  func.func @transform_5(%arg0: i32) -> (i32, i32) {
    %c0_i32 = arith.constant 0 : i32
    %c0_i32_0 = arith.constant 0 : i32
    %c0_i32_1 = arith.constant 0 : i32
    return %c0_i32, %c0_i32_0 : i32, i32
  }
  func.func @transform_6(%arg0: i32) -> (i32, i32) {
    %c0_i32 = arith.constant 0 : i32
    %c0_i32_0 = arith.constant 0 : i32
    %c0_i32_1 = arith.constant 0 : i32
    return %c0_i32, %c0_i32_0 : i32, i32
  }
  func.func @transform_7(%arg0: i32) -> (i32, i32) {
    %c0_i32 = arith.constant 0 : i32
    %c0_i32_0 = arith.constant 0 : i32
    %c0_i32_1 = arith.constant 0 : i32
    return %c0_i32, %c0_i32_0 : i32, i32
  }
  func.func @transform_8(%arg0: i32) -> (i32, i32) {
    %c0_i32 = arith.constant 0 : i32
    %c0_i32_0 = arith.constant 0 : i32
    %c0_i32_1 = arith.constant 0 : i32
    return %c0_i32, %c0_i32_0 : i32, i32
  }
  func.func @transform_9(%arg0: i32) -> (i32, i32) {
    %c0_i32 = arith.constant 0 : i32
    %c0_i32_0 = arith.constant 0 : i32
    %c0_i32_1 = arith.constant 0 : i32
    return %c0_i32, %c0_i32_0 : i32, i32
  }
  func.func @transform_10(%arg0: i32) -> (i32, i32) {
    %c0_i32 = arith.constant 0 : i32
    %c0_i32_0 = arith.constant 0 : i32
    return %arg0, %c0_i32 : i32, i32
  }
}

</mosaic_0001>

<bundles_post_ra>
// kernel: tpu_custom_call.1
= control target key start
LH: loop header
LB: loop body
LE: loop exit
PB: predicated region body
PF: predicated region fallthrough
CT: control target
= control target key end

     0   :  { %s2760_s0 = inlined_call_operand.hbm [shape: bf16[32,256], index: 0, kind: input, shape index: {}]   ;;  %s2761_s1 = inlined_call_operand.hbm [shape: bf16[32,512], index: 1, kind: input, shape index: {}]   ;;  %s2762_s2 = inlined_call_operand.hbm [shape: bf16[256,512], index: 2, kind: input, shape index: {}]   ;;  %s2763_s3 = inlined_call_operand.vmem [shape: f32[1,512], index: 3, kind: input, shape index: {}]   ;;  %s2764_s4 = inlined_call_operand.hbm [shape: bf16[512,256], index: 4, kind: input, shape index: {}]   ;;  %s2765_s5 = inlined_call_operand.vmem [shape: f32[1,256], index: 5, kind: input, shape index: {}]   ;;  %s2766_s6 = inlined_call_operand.hbm [shape: bf16[256,128], index: 6, kind: input, shape index: {}]   ;;  %s2767_s7 = inlined_call_operand.vmem [shape: f32[1,128], index: 7, kind: input, shape index: {}]   ;;  %s2768_s8 = inlined_call_operand.vmem [shape: f32[1,128], index: 8, kind: input, shape index: {}]   ;;  %s2769_s9 = inlined_call_operand.<no memory space> [shape: f32[1,1], index: 9, kind: input, shape index: {}]   ;;  %s2770_s10 = inlined_call_operand.hbm [shape: f32[32,128], index: 10, kind: output, shape index: {}]  }
   0x1   :  { %v15_v0 = vstv %s2769_s9 }
   0x2   :  { %16 = vst [vmem:[#allocation2] sm:$0x1] %v15_v0 }
   0x3   :  { %17 = vsyncpa [#allocation4], 0 }
   0x4   :  { %18 = vsyncpa [#allocation7], 0 }
   0x5   :  { %19 = vsyncpa [#allocation10], 0  ;;  %s38_s17 = sshll.u32 %s2761_s1, 4  ;;  %s39_s17 = int_to_ptr.hbm [resolvable:$true] %s38_s17 }
   0x6   :  { %20 = vsyncpa [#allocation5], 0  ;;  %s2570_s18 = smov [#allocation6]   ;;  %s2571_s20 = smov 256  }
   0x7   :  { %s40_s19 = sshll.u32 %s2570_s18, 4  ;;  %s2572_s21 = smov 16   ;;  %s41_s19 = int_to_ptr.vmem [resolvable:$true] %s40_s19 }
   0x8   :  { %46 = dma.hbm_to_vmem [thread:$0]  %s39_s17, 1024, %s41_s19, [#allocation7], %s2571_s20, %s2571_s20, %s2572_s21  }
   0x9   :  { %s66_s9 = sshll.u32 %s2764_s4, 4  ;;  %s2573_s24 = smov [#allocation9]   ;;  %s67_s9 = int_to_ptr.hbm [resolvable:$true] %s66_s9 }
   0xa   :  { %s68_s25 = sshll.u32 %s2573_s24, 4  ;;  %s25_s28 = sshll.u32 %s2760_s0, 4  ;;  %s69_s25 = int_to_ptr.vmem [resolvable:$true] %s68_s25  ;;  %s26_s28 = int_to_ptr.hbm [resolvable:$true] %s25_s28 }
   0xb   :  { %s2574_s1 = smov 128   ;;  %s2575_s29 = smov 8  }
   0xc   :  { %74 = dma.hbm_to_vmem [thread:$0]  %s67_s9, 8192, %s69_s25, [#allocation10], %s2574_s1, %s2574_s1, %s2575_s29  }
   0xd   :  { %s51_s12 = sshll.u32 %s2762_s2, 4  ;;  %s2576_s4 = smov [#allocation3]   ;;  %s52_s12 = int_to_ptr.hbm [resolvable:$true] %s51_s12 }
   0xe   :  { %s27_s13 = sshll.u32 %s2576_s4, 4  ;;  %s2577_s0 = smov [#allocation8]   ;;  %s28_s13 = int_to_ptr.vmem [resolvable:$true] %s27_s13 }
   0xf   :  { %33 = dma.hbm_to_vmem [thread:$0]  %s26_s28, 512, %s28_s13, [#allocation4], %s2574_s1, %s2574_s1, %s2575_s29  }
  0x10   :  { %s53_s14 = sshll.u32 %s2577_s0, 4  ;;  %s81_s17 = sshll.u32 %s2766_s6, 4  ;;  %s54_s14 = int_to_ptr.vmem [resolvable:$true] %s53_s14  ;;  %s82_s17 = int_to_ptr.hbm [resolvable:$true] %s81_s17 }
  0x11   :  { %59 = dma.hbm_to_vmem [thread:$0]  %s52_s12, 8192, %s54_s14, [#allocation7], %s2571_s20, %s2571_s20, %s2572_s21  }
  0x12   :  { %s2578_s18 = smov [#allocation11]   ;;  %s2579_s2 = smov 64  }
  0x13   :  { %s83_s19 = sshll.u32 %s2578_s18, 4  ;;  %s2580_s22 = smov 4   ;;  %s84_s19 = int_to_ptr.vmem [resolvable:$true] %s83_s19 }
  0x14   :  { %89 = dma.hbm_to_vmem [thread:$0]  %s82_s17, 2048, %s84_s19, [#allocation10], %s2579_s2, %s2579_s2, %s2580_s22  }
  0x15   :  { %2562 = dma.done.wait [#allocation4], 512  }
  0x16   :  { %2563 = vsyncadd [#allocation4], 4294966784 }
  0x17   :  { %2564 = dma.done.wait [#allocation7], 9216  }
  0x18   :  { %2565 = vsyncadd [#allocation7], 4294958080 }
  0x19   :  { %2566 = dma.done.wait [#allocation10], 10240  }
  0x1a   :  { %2567 = vsyncadd [#allocation10], 4294957056  ;;  %v1753_v1 = vld [vmem:[#allocation8 + $0xe0] sm:$0xf]  ;;  %v2253_v2 = vld [vmem:[#allocation8 + $0xec] sm:$0xf0] }
  0x1b   :  { %v1881_v3 = vld [vmem:[#allocation8 + $0x1e0] sm:$0xf]  ;;  %v1754_v4 = vor.u32 %v2253_v2, %v1753_v1  ;;  %v2285_v5 = vld [vmem:[#allocation8 + $0x1ec] sm:$0xf0]  ;;  %v2251_v6 = vld [vmem:[#allocation8 + $0xe4] sm:$0xf] }
  0x1c   :  { %v1755_v7 = vld [vmem:[#allocation8 + $0xf0] sm:$0xf0]  ;;  %v1882_v8 = vor.u32 %v2285_v5, %v1881_v3  ;;  %v2283_v10 = vld [vmem:[#allocation8 + $0x1e4] sm:$0xf]  ;;  %v1737_v12 = vld [vmem:[#allocation8 + $0xc0] sm:$0xf] }
  0x1d   :  { %v1758_v9 = vor.u32 %v2251_v6, %v1755_v7  ;;  %v1883_v11 = vld [vmem:[#allocation8 + $0x1f0] sm:$0xf0]  ;;  %548 = vmatpush.bf16.msra.mxu0 %v1754_v4  ;;  %v2249_v14 = vld [vmem:[#allocation8 + $0xcc] sm:$0xf0]  ;;  %v1865_v15 = vld [vmem:[#allocation8 + $0x1c0] sm:$0xf] }
  0x1e   :  { %v1886_v13 = vor.u32 %v2283_v10, %v1883_v11  ;;  %v2281_v16 = vld [vmem:[#allocation8 + $0x1cc] sm:$0xf0]  ;;  %567 = vmatpush.bf16.msra.mxu1 %v1882_v8  ;;  %v1738_v17 = vor.u32 %v2249_v14, %v1737_v12  ;;  %v2247_v19 = vld [vmem:[#allocation8 + $0xc4] sm:$0xf]  ;;  %v1739_v20 = vld [vmem:[#allocation8 + $0xd0] sm:$0xf0] }
  0x1f   :  { %586 = vmatpush.bf16.msra.mxu2 %v1758_v9  ;;  %v1866_v18 = vor.u32 %v2281_v16, %v1865_v15  ;;  %v2279_v21 = vld [vmem:[#allocation8 + $0x1c4] sm:$0xf]  ;;  %v1742_v22 = vor.u32 %v2247_v19, %v1739_v20  ;;  %v1867_v23 = vld [vmem:[#allocation8 + $0x1d0] sm:$0xf0]  ;;  %v1721_v24 = vld [vmem:[#allocation8 + $0xa0] sm:$0xf] }
  0x20   :  { %605 = vmatpush.bf16.msra.mxu3 %v1886_v13  ;;  %v2245_v25 = vld [vmem:[#allocation8 + $0xac] sm:$0xf0]  ;;  %v1870_v26 = vor.u32 %v2279_v21, %v1867_v23  ;;  %v1849_v27 = vld [vmem:[#allocation8 + $0x1a0] sm:$0xf]  ;;  %v2243_v29 = vld [vmem:[#allocation8 + $0xa4] sm:$0xf] }
  0x21   :  { %v2277_v28 = vld [vmem:[#allocation8 + $0x1ac] sm:$0xf0]  ;;  %549 = vmatpush.bf16.msra.mxu0 %v1738_v17  ;;  %v1722_v30 = vor.u32 %v2245_v25, %v1721_v24  ;;  %v1723_v31 = vld [vmem:[#allocation8 + $0xb0] sm:$0xf0]  ;;  %v2275_v32 = vld [vmem:[#allocation8 + $0x1a4] sm:$0xf] }
  0x22   :  { %v1851_v33 = vld [vmem:[#allocation8 + $0x1b0] sm:$0xf0]  ;;  %568 = vmatpush.bf16.msra.mxu1 %v1866_v18  ;;  %v1850_v34 = vor.u32 %v2277_v28, %v1849_v27  ;;  %v1726_v35 = vor.u32 %v2243_v29, %v1723_v31  ;;  %v1705_v36 = vld [vmem:[#allocation8 + $0x80] sm:$0xf]  ;;  %v2241_v37 = vld [vmem:[#allocation8 + $0x8c] sm:$0xf0] }
  0x23   :  { %587 = vmatpush.bf16.msra.mxu2 %v1742_v22  ;;  %v1833_v38 = vld [vmem:[#allocation8 + $0x180] sm:$0xf]  ;;  %v1854_v39 = vor.u32 %v2275_v32, %v1851_v33  ;;  %v2273_v40 = vld [vmem:[#allocation8 + $0x18c] sm:$0xf0]  ;;  %v2239_v41 = vld [vmem:[#allocation8 + $0x84] sm:$0xf]  ;;  %v1706_v45 = vor.u32 %v2241_v37, %v1705_v36 }
  0x24   :  { %606 = vmatpush.bf16.msra.mxu3 %v1870_v26  ;;  %v1707_v42 = vld [vmem:[#allocation8 + $0x90] sm:$0xf0]  ;;  %v2271_v43 = vld [vmem:[#allocation8 + $0x184] sm:$0xf]  ;;  %v1834_v46 = vor.u32 %v2273_v40, %v1833_v38  ;;  %v1689_v48 = vld [vmem:[#allocation8 + $0x60] sm:$0xf] }
  0x25   :  { %v1835_v44 = vld [vmem:[#allocation8 + $0x190] sm:$0xf0]  ;;  %550 = vmatpush.bf16.msra.mxu0 %v1722_v30  ;;  %v1710_v47 = vor.u32 %v2239_v41, %v1707_v42  ;;  %v2237_v49 = vld [vmem:[#allocation8 + $0x6c] sm:$0xf0]  ;;  %v1817_v50 = vld [vmem:[#allocation8 + $0x160] sm:$0xf] }
  0x26   :  { %569 = vmatpush.bf16.msra.mxu1 %v1850_v34  ;;  %v1838_v51 = vor.u32 %v2271_v43, %v1835_v44  ;;  %v2269_v52 = vld [vmem:[#allocation8 + $0x16c] sm:$0xf0]  ;;  %v2235_v53 = vld [vmem:[#allocation8 + $0x64] sm:$0xf]  ;;  %v1691_v54 = vld [vmem:[#allocation8 + $0x70] sm:$0xf0]  ;;  %v1690_v57 = vor.u32 %v2237_v49, %v1689_v48 }
  0x27   :  { %588 = vmatpush.bf16.msra.mxu2 %v1726_v35  ;;  %v2267_v55 = vld [vmem:[#allocation8 + $0x164] sm:$0xf]  ;;  %v1819_v56 = vld [vmem:[#allocation8 + $0x170] sm:$0xf0]  ;;  %v1818_v58 = vor.u32 %v2269_v52, %v1817_v50  ;;  %v1694_v59 = vor.u32 %v2235_v53, %v1691_v54  ;;  %v1673_v60 = vld [vmem:[#allocation8 + $0x40] sm:$0xf] }
  0x28   :  { %607 = vmatpush.bf16.msra.mxu3 %v1854_v39  ;;  %v2233_v61 = vld [vmem:[#allocation8 + $0x4c] sm:$0xf0]  ;;  %v1801_v62 = vld [vmem:[#allocation8 + $0x140] sm:$0xf]  ;;  %v1822_v63 = vor.u32 %v2267_v55, %v1819_v56  ;;  %v2231_v1 = vld [vmem:[#allocation8 + $0x44] sm:$0xf] }
  0x29   :  { %551 = vmatpush.bf16.msra.mxu0 %v1706_v45  ;;  %v2265_v0 = vld [vmem:[#allocation8 + $0x14c] sm:$0xf0]  ;;  %v1675_v2 = vld [vmem:[#allocation8 + $0x50] sm:$0xf0]  ;;  %v2263_v3 = vld [vmem:[#allocation8 + $0x144] sm:$0xf]  ;;  %v1674_v5 = vor.u32 %v2233_v61, %v1673_v60 }
  0x2a   :  { %570 = vmatpush.bf16.msra.mxu1 %v1834_v46  ;;  %v1803_v4 = vld [vmem:[#allocation8 + $0x150] sm:$0xf0]  ;;  %v1802_v6 = vor.u32 %v2265_v0, %v1801_v62  ;;  %v1678_v7 = vor.u32 %v2231_v1, %v1675_v2  ;;  %v1657_v8 = vld [vmem:[#allocation8 + $0x20] sm:$0xf]  ;;  %v2229_v9 = vld [vmem:[#allocation8 + $0x2c] sm:$0xf0] }
  0x2b   :  { %589 = vmatpush.bf16.msra.mxu2 %v1710_v47  ;;  %v1785_v10 = vld [vmem:[#allocation8 + $0x120] sm:$0xf]  ;;  %v1806_v11 = vor.u32 %v2263_v3, %v1803_v4  ;;  %v2261_v12 = vld [vmem:[#allocation8 + $0x12c] sm:$0xf0]  ;;  %v2227_v13 = vld [vmem:[#allocation8 + $0x24] sm:$0xf]  ;;  %v1658_v17 = vor.u32 %v2229_v9, %v1657_v8 }
  0x2c   :  { %608 = vmatpush.bf16.msra.mxu3 %v1838_v51  ;;  %v1659_v14 = vld [vmem:[#allocation8 + $0x30] sm:$0xf0]  ;;  %v2259_v15 = vld [vmem:[#allocation8 + $0x124] sm:$0xf]  ;;  %v1641_v18 = vld [vmem:[#allocation8] sm:$0xf]  ;;  %v1786_v20 = vor.u32 %v2261_v12, %v1785_v10 }
  0x2d   :  { %552 = vmatpush.bf16.msra.mxu0 %v1690_v57  ;;  %v1787_v16 = vld [vmem:[#allocation8 + $0x130] sm:$0xf0]  ;;  %v2225_v19 = vld [vmem:[#allocation8 + $0xc] sm:$0xf0]  ;;  %v1662_v21 = vor.u32 %v2227_v13, %v1659_v14  ;;  %v1769_v22 = vld [vmem:[#allocation8 + $0x100] sm:$0xf] }
  0x2e   :  { %571 = vmatpush.bf16.msra.mxu1 %v1818_v58  ;;  %v2257_v23 = vld [vmem:[#allocation8 + $0x10c] sm:$0xf0]  ;;  %v2223_v24 = vld [vmem:[#allocation8 + $0x4] sm:$0xf]  ;;  %v1790_v25 = vor.u32 %v2259_v15, %v1787_v16  ;;  %v1643_v26 = vld [vmem:[#allocation8 + $0x10] sm:$0xf0]  ;;  %v1642_v32 = vor.u32 %v2225_v19, %v1641_v18 }
  0x2f   :  { %590 = vmatpush.bf16.msra.mxu2 %v1694_v59  ;;  %v2255_v27 = vld [vmem:[#allocation8 + $0x104] sm:$0xf]  ;;  %v1771_v28 = vld [vmem:[#allocation8 + $0x110] sm:$0xf0]  ;;  %v1625_v29 = vld [vmem:[#allocation3] sm:$0xf]  ;;  %v1770_v36 = vor.u32 %v2257_v23, %v1769_v22  ;;  %v1646_v37 = vor.u32 %v2223_v24, %v1643_v26 }
  0x30   :  { %609 = vmatpush.bf16.msra.mxu3 %v1822_v63  ;;  %v2252_v30 = vld [vmem:[#allocation8 + $0xec] sm:$0xf]  ;;  %v1763_v31 = vld [vmem:[#allocation8 + $0xf8] sm:$0xf0]  ;;  %v2220_v33 = vld [vmem:[#allocation3 + $0x4] sm:$0xf0]  ;;  %v1774_v40 = vor.u32 %v2255_v27, %v1771_v28 }
  0x31   :  { %553 = vmatpush.bf16.msra.mxu0 %v1674_v5  ;;  %v1889_v34 = vld [vmem:[#allocation8 + $0x1e8] sm:$0xf]  ;;  %v2286_v35 = vld [vmem:[#allocation8 + $0x1f4] sm:$0xf0]  ;;  %v2219_v38 = vld [vmem:[#allocation3 + $0x4] sm:$0xf]  ;;  %v1766_v41 = vor.u32 %v2252_v30, %v1763_v31  ;;  %v2662_v45 = vor.u32 %v2220_v33, %v1625_v29 }
  0x32   :  { %572 = vmatpush.bf16.msra.mxu1 %v1802_v6  ;;  %v1627_v39 = vld [vmem:[#allocation3 + $0x8] sm:$0xf0]  ;;  %v1761_v42 = vld [vmem:[#allocation8 + $0xe8] sm:$0xf]  ;;  %v2254_v43 = vld [vmem:[#allocation8 + $0xf4] sm:$0xf0]  ;;  %v1890_v46 = vor.u32 %v2286_v35, %v1889_v34 }
  0x33   :  { %591 = vmatpush.bf16.msra.mxu2 %v1678_v7  ;;  %v2284_v44 = vld [vmem:[#allocation8 + $0x1ec] sm:$0xf]  ;;  %v1891_v47 = vld [vmem:[#allocation8 + $0x1f8] sm:$0xf0]  ;;  %v2664_v50 = vor.u32 %v2219_v38, %v1627_v39  ;;  %v1873_v51 = vld [vmem:[#allocation8 + $0x1c8] sm:$0xf]  ;;  %v1762_v53 = vor.u32 %v2254_v43, %v1761_v42 }
  0x34   :  { %610 = vmatpush.bf16.msra.mxu3 %v1806_v11  ;;  %v2248_v48 = vld [vmem:[#allocation8 + $0xcc] sm:$0xf]  ;;  %v1747_v49 = vld [vmem:[#allocation8 + $0xd8] sm:$0xf0]  ;;  %v2282_v52 = vld [vmem:[#allocation8 + $0x1d4] sm:$0xf0]  ;;  %v1894_v54 = vor.u32 %v2284_v44, %v1891_v47 }
  0x35   :  { %554 = vmatpush.bf16.msra.mxu0 %v1658_v17  ;;  %v1750_v55 = vor.u32 %v2248_v48, %v1747_v49  ;;  %v1745_v56 = vld [vmem:[#allocation8 + $0xc8] sm:$0xf]  ;;  %v2250_v57 = vld [vmem:[#allocation8 + $0xd4] sm:$0xf0]  ;;  %v2280_v58 = vld [vmem:[#allocation8 + $0x1cc] sm:$0xf]  ;;  %v1874_v59 = vor.u32 %v2282_v52, %v1873_v51 }
  0x36   :  { %573 = vmatpush.bf16.msra.mxu1 %v1786_v20  ;;  %v1875_v60 = vld [vmem:[#allocation8 + $0x1d8] sm:$0xf0]  ;;  %v2244_v61 = vld [vmem:[#allocation8 + $0xac] sm:$0xf]  ;;  %v1857_v63 = vld [vmem:[#allocation8 + $0x1a8] sm:$0xf]  ;;  %v1746_v1 = vor.u32 %v2250_v57, %v1745_v56 }
  0x37   :  { %592 = vmatpush.bf16.msra.mxu2 %v1662_v21  ;;  %v1731_v62 = vld [vmem:[#allocation8 + $0xb8] sm:$0xf0]  ;;  %v2278_v0 = vld [vmem:[#allocation8 + $0x1b4] sm:$0xf0]  ;;  %v1878_v2 = vor.u32 %v2280_v58, %v1875_v60  ;;  %v1729_v4 = vld [vmem:[#allocation8 + $0xa8] sm:$0xf] }
  0x38   :  { %611 = vmatpush.bf16.msra.mxu3 %v1790_v25  ;;  %v1734_v3 = vor.u32 %v2244_v61, %v1731_v62  ;;  %v2246_v5 = vld [vmem:[#allocation8 + $0xb4] sm:$0xf0]  ;;  %v2276_v6 = vld [vmem:[#allocation8 + $0x1ac] sm:$0xf]  ;;  %v1858_v7 = vor.u32 %v2278_v0, %v1857_v63  ;;  %v1859_v8 = vld [vmem:[#allocation8 + $0x1b8] sm:$0xf0] }
  0x39   :  { %555 = vmatpush.bf16.msra.mxu0 %v1642_v32  ;;  %v2240_v9 = vld [vmem:[#allocation8 + $0x8c] sm:$0xf]  ;;  %v1715_v10 = vld [vmem:[#allocation8 + $0x98] sm:$0xf0]  ;;  %v1841_v11 = vld [vmem:[#allocation8 + $0x188] sm:$0xf]  ;;  %v1730_v13 = vor.u32 %v2246_v5, %v1729_v4  ;;  %v1862_v17 = vor.u32 %v2276_v6, %v1859_v8 }
  0x3a   :  { %574 = vmatpush.bf16.msra.mxu1 %v1770_v36  ;;  %v2274_v12 = vld [vmem:[#allocation8 + $0x194] sm:$0xf0]  ;;  %v1713_v14 = vld [vmem:[#allocation8 + $0x88] sm:$0xf]  ;;  %v2272_v16 = vld [vmem:[#allocation8 + $0x18c] sm:$0xf]  ;;  %v1718_v18 = vor.u32 %v2240_v9, %v1715_v10 }
  0x3b   :  { %593 = vmatpush.bf16.msra.mxu2 %v1646_v37  ;;  %v2242_v15 = vld [vmem:[#allocation8 + $0x94] sm:$0xf0]  ;;  %v1843_v19 = vld [vmem:[#allocation8 + $0x198] sm:$0xf0]  ;;  %v1633_v20 = vld [vmem:[#allocation3 + $0x10] sm:$0xf]  ;;  %v1842_v22 = vor.u32 %v2274_v12, %v1841_v11 }
  0x3c   :  { %612 = vmatpush.bf16.msra.mxu3 %v1774_v40  ;;  %556 = vmatmul.bf16.vlgmr.msra.gmra.mxu0 %v2662_v45  ;;  %v2222_v21 = vld [vmem:[#allocation3 + $0x14] sm:$0xf0]  ;;  %v2221_v23 = vld [vmem:[#allocation3 + $0x14] sm:$0xf]  ;;  %v2236_v24 = vld [vmem:[#allocation8 + $0x6c] sm:$0xf]  ;;  %v1714_v29 = vor.u32 %v2242_v15, %v1713_v14  ;;  %v1846_v33 = vor.u32 %v2272_v16, %v1843_v19 }
  0x3d   :  { %575 = vmatmul.bf16.vlgmr.msra.gmra.mxu1 %v2664_v50  ;;  %624 = vmatpush.bf16.msrb.mxu0 %v1762_v53  ;;  %v1699_v25 = vld [vmem:[#allocation8 + $0x78] sm:$0xf0]  ;;  %v1825_v27 = vld [vmem:[#allocation8 + $0x168] sm:$0xf]  ;;  %v2270_v28 = vld [vmem:[#allocation8 + $0x174] sm:$0xf0]  ;;  %v2670_v36 = vor.u32 %v2222_v21, %v1633_v20 }
  0x3e   :  { %643 = vmatpush.bf16.msrb.mxu1 %v1890_v46  ;;  %594 = vmatmul.bf16.vlgmr.msra.gmra.mxu2 %v2662_v45  ;;  %v1635_v26 = vld [vmem:[#allocation3 + $0x18] sm:$0xf0]  ;;  %v1697_v30 = vld [vmem:[#allocation8 + $0x68] sm:$0xf]  ;;  %v2238_v31 = vld [vmem:[#allocation8 + $0x74] sm:$0xf0]  ;;  %v1702_v34 = vor.u32 %v2236_v24, %v1699_v25  ;;  %v1826_v37 = vor.u32 %v2270_v28, %v1825_v27 }
  0x3f   :  { %662 = vmatpush.bf16.msrb.mxu2 %v1766_v41  ;;  %613 = vmatmul.bf16.vlgmr.msra.gmra.mxu3 %v2664_v50  ;;  %v2268_v32 = vld [vmem:[#allocation8 + $0x16c] sm:$0xf]  ;;  %v1827_v35 = vld [vmem:[#allocation8 + $0x178] sm:$0xf0]  ;;  %v2672_v40 = vor.u32 %v2221_v23, %v1635_v26  ;;  %v1809_v41 = vld [vmem:[#allocation8 + $0x148] sm:$0xf]  ;;  %v1698_v43 = vor.u32 %v2238_v31, %v1697_v30 }
  0x40   :  { %681 = vmatpush.bf16.msrb.mxu3 %v1894_v54  ;;  %v2232_v38 = vld [vmem:[#allocation8 + $0x4c] sm:$0xf]  ;;  %v1683_v39 = vld [vmem:[#allocation8 + $0x58] sm:$0xf0]  ;;  %v2266_v42 = vld [vmem:[#allocation8 + $0x154] sm:$0xf0]  ;;  %v1830_v44 = vor.u32 %v2268_v32, %v1827_v35 }
  0x41   :  { %625 = vmatpush.bf16.msrb.mxu0 %v1746_v1  ;;  %v1686_v46 = vor.u32 %v2232_v38, %v1683_v39  ;;  %v1681_v47 = vld [vmem:[#allocation8 + $0x48] sm:$0xf]  ;;  %v2234_v48 = vld [vmem:[#allocation8 + $0x54] sm:$0xf0]  ;;  %v2264_v49 = vld [vmem:[#allocation8 + $0x14c] sm:$0xf]  ;;  %v1810_v51 = vor.u32 %v2266_v42, %v1809_v41 }
  0x42   :  { %644 = vmatpush.bf16.msrb.mxu1 %v1874_v59  ;;  %v1811_v52 = vld [vmem:[#allocation8 + $0x158] sm:$0xf0]  ;;  %v2228_v53 = vld [vmem:[#allocation8 + $0x2c] sm:$0xf]  ;;  %v2262_v56 = vld [vmem:[#allocation8 + $0x134] sm:$0xf0]  ;;  %v1682_v57 = vor.u32 %v2234_v48, %v1681_v47 }
  0x43   :  { %663 = vmatpush.bf16.msrb.mxu2 %v1750_v55  ;;  %v1667_v54 = vld [vmem:[#allocation8 + $0x38] sm:$0xf0]  ;;  %v1793_v55 = vld [vmem:[#allocation8 + $0x128] sm:$0xf]  ;;  %v1814_v58 = vor.u32 %v2264_v49, %v1811_v52  ;;  %v2230_v61 = vld [vmem:[#allocation8 + $0x34] sm:$0xf0] }
  0x44   :  { %682 = vmatpush.bf16.msrb.mxu3 %v1878_v2  ;;  %v1670_v59 = vor.u32 %v2228_v53, %v1667_v54  ;;  %v1665_v60 = vld [vmem:[#allocation8 + $0x28] sm:$0xf]  ;;  %v2260_v62 = vld [vmem:[#allocation8 + $0x12c] sm:$0xf]  ;;  %v1794_v63 = vor.u32 %v2262_v56, %v1793_v55  ;;  %v1795_v0 = vld [vmem:[#allocation8 + $0x138] sm:$0xf0] }
  0x45   :  { %626 = vmatpush.bf16.msrb.mxu0 %v1730_v13  ;;  %v2224_v1 = vld [vmem:[#allocation8 + $0xc] sm:$0xf]  ;;  %v1651_v2 = vld [vmem:[#allocation8 + $0x18] sm:$0xf0]  ;;  %v2258_v4 = vld [vmem:[#allocation8 + $0x114] sm:$0xf0]  ;;  %v1666_v5 = vor.u32 %v2230_v61, %v1665_v60  ;;  %v1798_v8 = vor.u32 %v2260_v62, %v1795_v0 }
  0x46   :  { %645 = vmatpush.bf16.msrb.mxu1 %v1858_v7  ;;  %v2017_v6 = vld [vmem:[#allocation9 + $0xf0] sm:$0xf]  ;;  %v2318_v7 = vld [vmem:[#allocation9 + $0xf4] sm:$0xf0]  ;;  %v1654_v9 = vor.u32 %v2224_v1, %v1651_v2  ;;  %v1649_v10 = vld [vmem:[#allocation8 + $0x8] sm:$0xf] }
  0x47   :  { %664 = vmatpush.bf16.msrb.mxu2 %v1734_v3  ;;  %v1777_v3 = vld [vmem:[#allocation8 + $0x108] sm:$0xf]  ;;  %v2226_v11 = vld [vmem:[#allocation8 + $0x14] sm:$0xf0]  ;;  %v2256_v12 = vld [vmem:[#allocation8 + $0x10c] sm:$0xf] }
  0x48   :  { %683 = vmatpush.bf16.msrb.mxu3 %v1862_v17  ;;  %v1778_v13 = vor.u32 %v2258_v4, %v1777_v3  ;;  %v1779_v14 = vld [vmem:[#allocation8 + $0x118] sm:$0xf0]  ;;  %v1953_v15 = vld [vmem:[#allocation9 + $0x70] sm:$0xf]  ;;  %v2302_v16 = vld [vmem:[#allocation9 + $0x74] sm:$0xf0]  ;;  %v2018_v17 = vor.u32 %v2318_v7, %v2017_v6 }
  0x49   :  { %627 = vmatpush.bf16.msrb.mxu0 %v1714_v29  ;;  %v1782_v19 = vor.u32 %v2256_v12, %v1779_v14  ;;  %v1954_v20 = vor.u32 %v2302_v16, %v1953_v15  ;;  %v1945_v21 = vld [vmem:[#allocation9 + $0x60] sm:$0xf]  ;;  %v2316_v24 = vld [vmem:[#allocation9 + $0xe4] sm:$0xf0]  ;;  %v1937_v27 = vld [vmem:[#allocation9 + $0x50] sm:$0xf] }
  0x4a   :  { %646 = vmatpush.bf16.msrb.mxu1 %v1842_v22  ;;  %v2300_v22 = vld [vmem:[#allocation9 + $0x64] sm:$0xf0]  ;;  %v2009_v23 = vld [vmem:[#allocation9 + $0xe0] sm:$0xf]  ;;  %v2298_v28 = vld [vmem:[#allocation9 + $0x54] sm:$0xf0] }
  0x4b   :  { %665 = vmatpush.bf16.msrb.mxu2 %v1718_v18  ;;  %v1650_v18 = vor.u32 %v2226_v11, %v1649_v10  ;;  %v1946_v25 = vor.u32 %v2300_v22, %v1945_v21  ;;  %v2010_v26 = vor.u32 %v2316_v24, %v2009_v23  ;;  %v1938_v29 = vor.u32 %v2298_v28, %v1937_v27  ;;  %v1929_v30 = vld [vmem:[#allocation9 + $0x40] sm:$0xf]  ;;  %v2296_v31 = vld [vmem:[#allocation9 + $0x44] sm:$0xf0]  ;;  %v2294_v35 = vld [vmem:[#allocation9 + $0x34] sm:$0xf0] }
  0x4c   :  { %684 = vmatpush.bf16.msrb.mxu3 %v1846_v33  ;;  %561 = vmatmul.bf16.gmra.mxu0 %v2670_v36  ;;  %v1930_v32 = vor.u32 %v2296_v31, %v1929_v30  ;;  %v2001_v33 = vld [vmem:[#allocation9 + $0xd0] sm:$0xf]  ;;  %v1993_v38 = vld [vmem:[#allocation9 + $0xc0] sm:$0xf]  ;;  %v2312_v39 = vld [vmem:[#allocation9 + $0xc4] sm:$0xf0] }
  0x4d   :  { %580 = vmatmul.bf16.gmra.mxu1 %v2672_v40  ;;  %628 = vmatpush.bf16.msrb.mxu0 %v1698_v43  ;;  %v1994_v41 = vor.u32 %v2312_v39, %v1993_v38  ;;  %v1913_v42 = vld [vmem:[#allocation9 + $0x20] sm:$0xf]  ;;  %v2292_v43 = vld [vmem:[#allocation9 + $0x24] sm:$0xf0]  ;;  %v1905_v47 = vld [vmem:[#allocation9 + $0x10] sm:$0xf] }
  0x4e   :  { %647 = vmatpush.bf16.msrb.mxu1 %v1826_v37  ;;  %599 = vmatmul.bf16.gmra.mxu2 %v2670_v36  ;;  %v2290_v48 = vld [vmem:[#allocation9 + $0x14] sm:$0xf0]  ;;  %v2308_v52 = vld [vmem:[#allocation9 + $0xa4] sm:$0xf0]  ;;  %v1897_v54 = vld [vmem:[#allocation9] sm:$0xf] }
  0x4f   :  { %666 = vmatpush.bf16.msrb.mxu2 %v1702_v34  ;;  %618 = vmatmul.bf16.gmra.mxu3 %v2672_v40  ;;  %v2314_v34 = vld [vmem:[#allocation9 + $0xd4] sm:$0xf0]  ;;  %v1906_v49 = vor.u32 %v2290_v48, %v1905_v47  ;;  %v2288_v55 = vld [vmem:[#allocation9 + $0x4] sm:$0xf0]  ;;  %v2081_v60 = vld [vmem:[#allocation9 + $0x170] sm:$0xf] }
  0x50   :  { %685 = vmatpush.bf16.msrb.mxu3 %v1830_v44  ;;  %v2310_v44 = vld [vmem:[#allocation9 + $0xb4] sm:$0xf0]  ;;  %v1898_v56 = vor.u32 %v2288_v55, %v1897_v54  ;;  %v2301_v62 = vld [vmem:[#allocation9 + $0x74] sm:$0xf]  ;;  %v1955_v0 = vld [vmem:[#allocation9 + $0x78] sm:$0xf0] }
  0x51   :  { %629 = vmatpush.bf16.msrb.mxu0 %v1682_v57  ;;  %v1969_v57 = vld [vmem:[#allocation9 + $0x90] sm:$0xf]  ;;  %v2334_v61 = vld [vmem:[#allocation9 + $0x174] sm:$0xf0]  ;;  %v1958_v1 = vor.u32 %v2301_v62, %v1955_v0  ;;  %v1961_v2 = vld [vmem:[#allocation9 + $0x80] sm:$0xf] }
  0x52   :  { %648 = vmatpush.bf16.msrb.mxu1 %v1810_v51  ;;  %v1977_v51 = vld [vmem:[#allocation9 + $0xa0] sm:$0xf]  ;;  %v2304_v3 = vld [vmem:[#allocation9 + $0x84] sm:$0xf0]  ;;  %v2299_v7 = vld [vmem:[#allocation9 + $0x64] sm:$0xf] }
  0x53   :  { %667 = vmatpush.bf16.msrb.mxu2 %v1686_v46  ;;  %v1978_v53 = vor.u32 %v2308_v52, %v1977_v51  ;;  %v1962_v4 = vor.u32 %v2304_v3, %v1961_v2  ;;  %v2332_v6 = vld [vmem:[#allocation9 + $0x164] sm:$0xf0]  ;;  %v2145_v11 = vld [vmem:[#allocation9 + $0x1f0] sm:$0xf]  ;;  %v2350_v12 = vld [vmem:[#allocation9 + $0x1f4] sm:$0xf0] }
  0x54   :  { %686 = vmatpush.bf16.msrb.mxu3 %v1814_v58  ;;  %v2306_v58 = vld [vmem:[#allocation9 + $0x94] sm:$0xf0]  ;;  %v2146_v14 = vor.u32 %v2350_v12, %v2145_v11  ;;  %v2019_v15 = vld [vmem:[#allocation9 + $0xf8] sm:$0xf0]  ;;  %v2137_v24 = vld [vmem:[#allocation9 + $0x1e0] sm:$0xf] }
  0x55   :  { %630 = vmatpush.bf16.msrb.mxu0 %v1666_v5  ;;  %v2073_v5 = vld [vmem:[#allocation9 + $0x160] sm:$0xf]  ;;  %v1939_v22 = vld [vmem:[#allocation9 + $0x58] sm:$0xf0]  ;;  %v2011_v28 = vld [vmem:[#allocation9 + $0xe8] sm:$0xf0] }
  0x56   :  { %649 = vmatpush.bf16.msrb.mxu1 %v1794_v63  ;;  %v2082_v63 = vor.u32 %v2334_v61, %v2081_v60  ;;  %v2057_v31 = vld [vmem:[#allocation9 + $0x140] sm:$0xf]  ;;  %v2129_v38 = vld [vmem:[#allocation9 + $0x1d0] sm:$0xf]  ;;  %v2346_v39 = vld [vmem:[#allocation9 + $0x1d4] sm:$0xf0] }
  0x57   :  { %668 = vmatpush.bf16.msrb.mxu2 %v1670_v59  ;;  %v1970_v59 = vor.u32 %v2306_v58, %v1969_v57  ;;  %v2326_v47 = vld [vmem:[#allocation9 + $0x134] sm:$0xf0]  ;;  %v2293_v48 = vld [vmem:[#allocation9 + $0x34] sm:$0xf]  ;;  %v1923_v52 = vld [vmem:[#allocation9 + $0x38] sm:$0xf0] }
  0x58   :  { %687 = vmatpush.bf16.msrb.mxu3 %v1798_v8  ;;  %v2074_v8 = vor.u32 %v2332_v6, %v2073_v5  ;;  %v1926_v54 = vor.u32 %v2293_v48, %v1923_v52  ;;  %v2121_v55 = vld [vmem:[#allocation9 + $0x1c0] sm:$0xf]  ;;  %v2311_v57 = vld [vmem:[#allocation9 + $0xc4] sm:$0xf]  ;;  %v1995_v60 = vld [vmem:[#allocation9 + $0xc8] sm:$0xf0] }
  0x59   :  { %631 = vmatpush.bf16.msrb.mxu0 %v1650_v18  ;;  %v2330_v18 = vld [vmem:[#allocation9 + $0x154] sm:$0xf0]  ;;  %v1998_v0 = vor.u32 %v2311_v57, %v1995_v60  ;;  %v2324_v2 = vld [vmem:[#allocation9 + $0x124] sm:$0xf0]  ;;  %v2291_v6 = vld [vmem:[#allocation9 + $0x24] sm:$0xf] }
  0x5a   :  { %650 = vmatpush.bf16.msrb.mxu1 %v1778_v13  ;;  %v2317_v13 = vld [vmem:[#allocation9 + $0xf4] sm:$0xf]  ;;  %v2113_v11 = vld [vmem:[#allocation9 + $0x1b0] sm:$0xf]  ;;  %v2342_v12 = vld [vmem:[#allocation9 + $0x1b4] sm:$0xf0] }
  0x5b   :  { %669 = vmatpush.bf16.msrb.mxu2 %v1654_v9  ;;  %v1947_v9 = vld [vmem:[#allocation9 + $0x68] sm:$0xf0]  ;;  %v2022_v16 = vor.u32 %v2317_v13, %v2019_v15  ;;  %v2309_v13 = vld [vmem:[#allocation9 + $0xb4] sm:$0xf]  ;;  %v2114_v15 = vor.u32 %v2342_v12, %v2113_v11  ;;  %v1971_v60 = vld [vmem:[#allocation9 + $0x98] sm:$0xf0] }
  0x5c   :  { %688 = vmatpush.bf16.msrb.mxu3 %v1782_v19  ;;  %632 = vmatmul.bf16.vlgmr.msrb.gmra.mxu0 %v2662_v45  ;;  %v1950_v10 = vor.u32 %v2299_v7, %v1947_v9  ;;  %v2297_v19 = vld [vmem:[#allocation9 + $0x54] sm:$0xf]  ;;  %v1915_v7 = vld [vmem:[#allocation9 + $0x28] sm:$0xf0]  ;;  %s1608_s27 = sshll.u32 %s2770_s10, 4  ;;  %s1609_s27 = int_to_ptr.hbm [resolvable:$true] %s1608_s27 }
  0x5d   :  { %1140 = vmatpush.bf16.msra.mxu0 %v1954_v20  ;;  %651 = vmatmul.bf16.vlgmr.msrb.gmra.mxu1 %v2664_v50  ;;  %v2686_v20 = vld [vmem:[#allocation6] sm:$0xff]  ;;  %v1942_v23 = vor.u32 %v2297_v19, %v1939_v22  ;;  %v1963_v12 = vld [vmem:[#allocation9 + $0x88] sm:$0xf0] }
  0x5e   :  { %1159 = vmatpush.bf16.msra.mxu1 %v2018_v17  ;;  %670 = vmatmul.bf16.vlgmr.msrb.gmra.mxu2 %v2662_v45  ;;  %v2002_v45 = vor.u32 %v2314_v34, %v2001_v33  ;;  %v2065_v17 = vld [vmem:[#allocation9 + $0x150] sm:$0xf]  ;;  %v2295_v33 = vld [vmem:[#allocation9 + $0x44] sm:$0xf]  ;;  %v193_v58 = vunpack.c.h.bf16 %v2686_v20 }
  0x5f   :  { %689 = vmatmul.bf16.vlgmr.msrb.gmra.mxu3 %v2664_v50  ;;  %v1921_v50 = vld [vmem:[#allocation9 + $0x30] sm:$0xf]  ;;  %1178 = vmatpush.bf16.msra.mxu2 %v2082_v63  ;;  %v2066_v21 = vor.u32 %v2330_v18, %v2065_v17 }
  0x60   :  { %v1922_v37 = vor.u32 %v2294_v35, %v1921_v50  ;;  %1197 = vmatpush.bf16.msra.mxu3 %v2146_v14  ;;  %v1931_v50 = vld [vmem:[#allocation9 + $0x48] sm:$0xf0] }
  0x61   :  { %1141 = vmatpush.bf16.msra.mxu0 %v1946_v25  ;;  %v2348_v25 = vld [vmem:[#allocation9 + $0x1e4] sm:$0xf0] }
  0x62   :  { %1160 = vmatpush.bf16.msra.mxu1 %v2010_v26  ;;  %v2315_v26 = vld [vmem:[#allocation9 + $0xe4] sm:$0xf]  ;;  %v2138_v27 = vor.u32 %v2348_v25, %v2137_v24  ;;  %v2289_v25 = vld [vmem:[#allocation9 + $0x14] sm:$0xf] }
  0x63   :  { %1179 = vmatpush.bf16.msra.mxu2 %v2074_v8  ;;  %v2014_v30 = vor.u32 %v2315_v26, %v2011_v28  ;;  %v1907_v26 = vld [vmem:[#allocation9 + $0x18] sm:$0xf0] }
  0x64   :  { %1198 = vmatpush.bf16.msra.mxu3 %v2138_v27  ;;  %v1910_v28 = vor.u32 %v2289_v25, %v1907_v26  ;;  %v2349_v25 = vld [vmem:[#allocation9 + $0x1f4] sm:$0xf]  ;;  %v2147_v26 = vld [vmem:[#allocation9 + $0x1f8] sm:$0xf0] }
  0x65   :  { %1142 = vmatpush.bf16.msra.mxu0 %v1938_v29  ;;  %v192_v29 = vunpack.c.l.bf16 %v2686_v20  ;;  %v2033_v20 = vld [vmem:[#allocation9 + $0x110] sm:$0xf] }
  0x66   :  { %1161 = vmatpush.bf16.msra.mxu1 %v2002_v45 }
  0x67   :  { %1180 = vmatpush.bf16.msra.mxu2 %v2066_v21  ;;  %v2322_v21 = vld [vmem:[#allocation9 + $0x114] sm:$0xf0] }
  0x68   :  { %v2034_v24 = vor.u32 %v2322_v21, %v2033_v20 }
  0x69   :  { %1143 = vmatpush.bf16.msra.mxu0 %v1930_v32  ;;  %v2328_v32 = vld [vmem:[#allocation9 + $0x144] sm:$0xf0] }
  0x6a   :  { %1162 = vmatpush.bf16.msra.mxu1 %v1994_v41  ;;  %v2058_v45 = vor.u32 %v2328_v32, %v2057_v31  ;;  %v2313_v41 = vld [vmem:[#allocation9 + $0xd4] sm:$0xf]  ;;  %v2307_v31 = vld [vmem:[#allocation9 + $0xa4] sm:$0xf] }
  0x6c   :  { %637 = vmatmul.bf16.gmra.mxu0 %v2670_v36  ;;  %1181 = vmatpush.bf16.msra.mxu2 %v2058_v45  ;;  %v1979_v45 = vld [vmem:[#allocation9 + $0xa8] sm:$0xf0] }
  0x6d   :  { %656 = vmatmul.bf16.gmra.mxu1 %v2672_v40  ;;  %1144 = vmatpush.bf16.msra.mxu0 %v1922_v37  ;;  %v1934_v37 = vor.u32 %v2295_v33, %v1931_v50 }
  0x6e   :  { %675 = vmatmul.bf16.gmra.mxu2 %v2670_v36  ;;  %v1914_v36 = vor.u32 %v2292_v43, %v1913_v42  ;;  %v2689_v42 = vld [vmem:[#allocation6 + $0x10] sm:$0xff]  ;;  %v2130_v43 = vor.u32 %v2346_v39, %v2129_v38  ;;  %v1982_v39 = vor.u32 %v2307_v31, %v1979_v45  ;;  %v2067_v31 = vld [vmem:[#allocation9 + $0x158] sm:$0xf0] }
  0x6f   :  { %694 = vmatmul.bf16.gmra.mxu3 %v2672_v40  ;;  %v1985_v40 = vld [vmem:[#allocation9 + $0xb0] sm:$0xf]  ;;  %v197_v22 = vunpack.c.h.bf16 %v2689_v42 }
  0x70   :  { %v1986_v46 = vor.u32 %v2310_v44, %v1985_v40  ;;  %1199 = vmatpush.bf16.msra.mxu3 %v2130_v43 }
  0x71   :  { %1145 = vmatpush.bf16.msra.mxu0 %v1914_v36  ;;  %v2003_v36 = vld [vmem:[#allocation9 + $0xd8] sm:$0xf0] }
  0x72   :  { %1163 = vmatpush.bf16.msra.mxu1 %v1986_v46  ;;  %v2006_v44 = vor.u32 %v2313_v41, %v2003_v36  ;;  %v2049_v46 = vld [vmem:[#allocation9 + $0x130] sm:$0xf]  ;;  %v2025_v41 = vld [vmem:[#allocation9 + $0x100] sm:$0xf] }
  0x73   :  { %v2050_v51 = vor.u32 %v2326_v47, %v2049_v46  ;;  %v2287_v46 = vld [vmem:[#allocation9 + $0x4] sm:$0xf]  ;;  %v1899_v47 = vld [vmem:[#allocation9 + $0x8] sm:$0xf0] }
  0x74   :  { %v1902_v52 = vor.u32 %v2287_v46, %v1899_v47 }
  0x75   :  { %1146 = vmatpush.bf16.msra.mxu0 %v1906_v49  ;;  %v2694_v49 = vld [vmem:[%s2763_s3] sm:$0xf]  ;;  %1182 = vmatpush.bf16.msra.mxu2 %v2050_v51 }
  0x76   :  { %1164 = vmatpush.bf16.msra.mxu1 %v1978_v53  ;;  %v196_v53 = vunpack.c.l.bf16 %v2689_v42  ;;  %v2699_v62 = vperm.slane %v2694_v49, 0  ;;  %v2707_v33 = vperm.slane %v2694_v49, 1  ;;  %v2320_v42 = vld [vmem:[#allocation9 + $0x104] sm:$0xf0] }
  0x79   :  { %1147 = vmatpush.bf16.msra.mxu0 %v1898_v56  ;;  %v2344_v56 = vld [vmem:[#allocation9 + $0x1c4] sm:$0xf0] }
  0x7a   :  { %1165 = vmatpush.bf16.msra.mxu1 %v1970_v59  ;;  %v2122_v59 = vor.u32 %v2344_v56, %v2121_v55  ;;  %v2305_v55 = vld [vmem:[#allocation9 + $0x94] sm:$0xf] }
  0x7c   :  { %1200 = vmatpush.bf16.msra.mxu3 %v2122_v59 }
  0x7d   :  { %1216 = vmatpush.bf16.msrb.mxu0 %v1958_v1  ;;  %v2041_v1 = vld [vmem:[#allocation9 + $0x120] sm:$0xf] }
  0x7e   :  { %1166 = vmatpush.bf16.msra.mxu1 %v1962_v4  ;;  %v2042_v5 = vor.u32 %v2324_v2, %v2041_v1  ;;  %v2083_v1 = vld [vmem:[#allocation9 + $0x178] sm:$0xf0] }
  0x80   :  { %1183 = vmatpush.bf16.msra.mxu2 %v2042_v5  ;;  %1201 = vmatpush.bf16.msra.mxu3 %v2114_v15  ;;  %v2089_v5 = vld [vmem:[#allocation9 + $0x180] sm:$0xf] }
  0x81   :  { %1217 = vmatpush.bf16.msrb.mxu0 %v1950_v10  ;;  %v1918_v10 = vor.u32 %v2291_v6, %v1915_v7  ;;  %v2336_v6 = vld [vmem:[#allocation9 + $0x184] sm:$0xf0]  ;;  %v2303_v7 = vld [vmem:[#allocation9 + $0x84] sm:$0xf] }
  0x82   :  { %1235 = vmatpush.bf16.msrb.mxu1 %v2022_v16  ;;  %v1987_v16 = vld [vmem:[#allocation9 + $0xb8] sm:$0xf0]  ;;  %v2090_v11 = vor.u32 %v2336_v6, %v2089_v5  ;;  %v1966_v15 = vor.u32 %v2303_v7, %v1963_v12  ;;  %v2731_v12 = vperm.slane %v2694_v49, 2 }
  0x83   :  { %v1990_v19 = vor.u32 %v2309_v13, %v1987_v16  ;;  %v2331_v16 = vld [vmem:[#allocation9 + $0x164] sm:$0xf] }
  0x84   :  { %1184 = vmatpush.bf16.msra.mxu2 %v2034_v24 }
  0x85   :  { %1218 = vmatpush.bf16.msrb.mxu0 %v1942_v23  ;;  %v2703_v23 = vld [vmem:[#allocation6 + $0x20] sm:$0xff] }
  0x86   :  { %1236 = vmatpush.bf16.msrb.mxu1 %v2014_v30  ;;  %v2340_v30 = vld [vmem:[#allocation9 + $0x1a4] sm:$0xf0]  ;;  %v200_v38 = vunpack.c.l.bf16 %v2703_v23 }
  0x89   :  { %1219 = vmatpush.bf16.msrb.mxu0 %v1934_v37 }
  0x8a   :  { %1237 = vmatpush.bf16.msrb.mxu1 %v2006_v44  ;;  %v2026_v44 = vor.u32 %v2320_v42, %v2025_v41 }
  0x8c   :  { %1185 = vmatpush.bf16.msra.mxu2 %v2026_v44 }
  0x8d   :  { %1220 = vmatpush.bf16.msrb.mxu0 %v1926_v54  ;;  %v2338_v54 = vld [vmem:[#allocation9 + $0x194] sm:$0xf0] }
  0x8e   :  { %1238 = vmatpush.bf16.msrb.mxu1 %v1998_v0  ;;  %v2333_v0 = vld [vmem:[#allocation9 + $0x174] sm:$0xf] }
  0x91   :  { %1221 = vmatpush.bf16.msrb.mxu0 %v1918_v10  ;;  %v201_v10 = vunpack.c.h.bf16 %v2703_v23 }
  0x92   :  { %1239 = vmatpush.bf16.msrb.mxu1 %v1990_v19 }
  0x95   :  { %1222 = vmatpush.bf16.msrb.mxu0 %v1910_v28 }
  0x96   :  { %1240 = vmatpush.bf16.msrb.mxu1 %v1982_v39 }
  0x99   :  { %1223 = vmatpush.bf16.msrb.mxu0 %v1902_v52 }
  0xb9   :  { %v557_v34 = vpop.f32.mrf.mxu0 }
  0xba   :  { %v576_v35 = vpop.f32.mrf.mxu1  ;;  %v558_v40 = vadd.f32 %v557_v34, %v192_v29  ;;  %v2105_v29 = vld [vmem:[#allocation9 + $0x1a0] sm:$0xf] }
  0xbb   :  { %v2106_v34 = vor.u32 %v2340_v30, %v2105_v29  ;;  %v2329_v30 = vld [vmem:[#allocation9 + $0x154] sm:$0xf] }
  0xbc   :  { %v577_v61 = vadd.f32 %v576_v35, %v558_v40 }
  0xbd   :  { %1202 = vmatpush.bf16.msra.mxu3 %v2106_v34  ;;  %v2070_v34 = vor.u32 %v2329_v30, %v2067_v31  ;;  %v2107_v30 = vld [vmem:[#allocation9 + $0x1a8] sm:$0xf0]  ;;  %v2319_v31 = vld [vmem:[#allocation9 + $0x104] sm:$0xf] }
  0xbe   :  { %v710_v17 = vadd.f32 %v2699_v62, %v577_v61 }
  0xc0   :  { %v726_v50 = vmax.f32 %v710_v17, 0.0  ;;  %v2075_v17 = vld [vmem:[#allocation9 + $0x168] sm:$0xf0] }
  0xc1   :  { %v595_v63 = vpop.f32.mrf.mxu2  ;;  %v559_v4 = vpop.f32.mrf.mxu0  ;;  %v2078_v21 = vor.u32 %v2331_v16, %v2075_v17 }
  0xc2   :  { %v614_v3 = vpop.f32.mrf.mxu3  ;;  %v560_v8 = vadd.f32 %v559_v4, %v196_v53  ;;  %v578_v9 = vpop.f32.mrf.mxu1  ;;  %v596_v14 = vadd.f32 %v595_v63, %v193_v58  ;;  %v2097_v53 = vld [vmem:[#allocation9 + $0x190] sm:$0xf]  ;;  %v1974_v63 = vor.u32 %v2305_v55, %v1971_v60  ;;  %v2131_v55 = vld [vmem:[#allocation9 + $0x1d8] sm:$0xf0]  ;;  %v2325_v60 = vld [vmem:[#allocation9 + $0x134] sm:$0xf] }
  0xc3   :  { %v2713_v58 = vld [vmem:[#allocation6 + $0x30] sm:$0xff]  ;;  %v2098_v59 = vor.u32 %v2338_v54, %v2097_v53 }
  0xc4   :  { %v579_v18 = vadd.f32 %v578_v9, %v560_v8  ;;  %v615_v32 = vadd.f32 %v614_v3, %v596_v14  ;;  %v2086_v3 = vor.u32 %v2333_v0, %v2083_v1  ;;  %v204_v4 = vunpack.c.l.bf16 %v2713_v58  ;;  %1241 = vmatpush.bf16.msrb.mxu1 %v1974_v63 }
  0xc5   :  { %1203 = vmatpush.bf16.msra.mxu3 %v2098_v59  ;;  %v187_v59 = vld [vmem:[#allocation6 + $0x18] sm:$0xff] }
  0xc6   :  { %v714_v27 = vadd.f32 %v2699_v62, %v579_v18  ;;  %v711_v56 = vadd.f32 %v2707_v33, %v615_v32  ;;  %1254 = vmatpush.bf16.msrb.mxu2 %v2086_v3  ;;  %v205_v32 = vunpack.c.h.bf16 %v2713_v58  ;;  %v2123_v3 = vld [vmem:[#allocation9 + $0x1c8] sm:$0xf0]  ;;  %v198_v6 = vunpack.c.l.bf16 %v187_v59 }
  0xc8   :  { %v730_v35 = vmax.f32 %v714_v27, 0.0  ;;  %v727_v8 = vmax.f32 %v711_v56, 0.0  ;;  %1242 = vmatpush.bf16.msrb.mxu1 %v1966_v15  ;;  %v2150_v27 = vor.u32 %v2349_v25, %v2147_v26  ;;  %v2321_v25 = vld [vmem:[#allocation9 + $0x114] sm:$0xf]  ;;  %v2035_v26 = vld [vmem:[#allocation9 + $0x118] sm:$0xf0] }
  0xc9   :  { %v597_v37 = vpop.f32.mrf.mxu2  ;;  %v562_v40 = vpop.f32.mrf.mxu0  ;;  %1204 = vmatpush.bf16.msra.mxu3 %v2090_v11 }
  0xca   :  { %v598_v43 = vadd.f32 %v597_v37, %v197_v22  ;;  %v616_v36 = vpop.f32.mrf.mxu3  ;;  %v2710_v48 = vpack.c.bf16 %v730_v35, %v726_v50  ;;  %v581_v51 = vpop.f32.mrf.mxu1  ;;  %v563_v61 = vadd.f32 %v562_v40, %v200_v38  ;;  %1255 = vmatpush.bf16.msrb.mxu2 %v2078_v21  ;;  %v185_v50 = vld [vmem:[#allocation6 + $0x8] sm:$0xff]  ;;  %v2347_v35 = vld [vmem:[#allocation9 + $0x1e4] sm:$0xf] }
  0xcb   :  { %v2139_v37 = vld [vmem:[#allocation9 + $0x1e8] sm:$0xf0]  ;;  %v194_v47 = vunpack.c.l.bf16 %v185_v50 }
  0xcc   :  { %v617_v57 = vadd.f32 %v616_v36, %v598_v43  ;;  %1148 = vmatmul.bf16.vlgmr.msra.gmra.mxu0 %v2710_v48  ;;  %v582_v13 = vadd.f32 %v581_v51, %v563_v61  ;;  %v2142_v39 = vor.u32 %v2347_v35, %v2139_v37  ;;  %v2327_v36 = vld [vmem:[#allocation9 + $0x144] sm:$0xf]  ;;  %v2059_v40 = vld [vmem:[#allocation9 + $0x148] sm:$0xf0]  ;;  %v2051_v61 = vld [vmem:[#allocation9 + $0x138] sm:$0xf0] }
  0xcd   :  { %1273 = vmatpush.bf16.msrb.mxu3 %v2150_v27  ;;  %v2062_v51 = vor.u32 %v2327_v36, %v2059_v40  ;;  %v2054_v1 = vor.u32 %v2325_v60, %v2051_v61  ;;  %v2337_v35 = vld [vmem:[#allocation9 + $0x194] sm:$0xf]  ;;  %v2099_v37 = vld [vmem:[#allocation9 + $0x198] sm:$0xf0] }
  0xce   :  { %v715_v2 = vadd.f32 %v2707_v33, %v617_v57  ;;  %v718_v28 = vadd.f32 %v2699_v62, %v582_v13  ;;  %1256 = vmatpush.bf16.msrb.mxu2 %v2070_v34  ;;  %v199_v34 = vunpack.c.h.bf16 %v187_v59  ;;  %v2091_v59 = vld [vmem:[#allocation9 + $0x188] sm:$0xf0] }
  0xd0   :  { %v731_v9 = vmax.f32 %v715_v2, 0.0  ;;  %v734_v41 = vmax.f32 %v718_v28, 0.0  ;;  %v2343_v2 = vld [vmem:[#allocation9 + $0x1c4] sm:$0xf] }
  0xd1   :  { %v600_v14 = vpop.f32.mrf.mxu2  ;;  %v564_v20 = vpop.f32.mrf.mxu0  ;;  %1274 = vmatpush.bf16.msrb.mxu3 %v2142_v39  ;;  %v2126_v7 = vor.u32 %v2343_v2, %v2123_v3 }
  0xd2   :  { %v2719_v18 = vpack.c.bf16 %v731_v9, %v727_v8  ;;  %v619_v19 = vpop.f32.mrf.mxu3  ;;  %v565_v22 = vadd.f32 %v564_v20, %v204_v4  ;;  %v583_v24 = vpop.f32.mrf.mxu1  ;;  %v601_v23 = vadd.f32 %v600_v14, %v201_v10  ;;  %1257 = vmatpush.bf16.msrb.mxu2 %v2062_v51  ;;  %v195_v8 = vunpack.c.h.bf16 %v185_v50  ;;  %v2323_v9 = vld [vmem:[#allocation9 + $0x124] sm:$0xf]  ;;  %v2043_v10 = vld [vmem:[#allocation9 + $0x128] sm:$0xf0]  ;;  %v2115_v20 = vld [vmem:[#allocation9 + $0x1b8] sm:$0xf0] }
  0xd3   :  { %v2046_v15 = vor.u32 %v2323_v9, %v2043_v10 }
  0xd4   :  { %1167 = vmatmul.bf16.vlgmr.msra.gmra.mxu1 %v2719_v18  ;;  %v584_v29 = vadd.f32 %v583_v24, %v565_v22  ;;  %v620_v38 = vadd.f32 %v619_v19, %v601_v23  ;;  %v2341_v19 = vld [vmem:[#allocation9 + $0x1b4] sm:$0xf]  ;;  %v2339_v23 = vld [vmem:[#allocation9 + $0x1a4] sm:$0xf] }
  0xd5   :  { %v2118_v22 = vor.u32 %v2341_v19, %v2115_v20  ;;  %v2110_v50 = vor.u32 %v2339_v23, %v2107_v30  ;;  %v2354_v30 = vld [vmem:[#allocation11 + $0x18] sm:$0xff] }
  0xd6   :  { %v722_v45 = vadd.f32 %v2699_v62, %v584_v29  ;;  %v2345_v62 = vld [vmem:[#allocation9 + $0x1d4] sm:$0xf]  ;;  %v719_v56 = vadd.f32 %v2707_v33, %v620_v38  ;;  %1258 = vmatpush.bf16.msrb.mxu2 %v2054_v1  ;;  %v2038_v29 = vor.u32 %v2321_v25, %v2035_v26 }
  0xd7   :  { %v2134_v58 = vor.u32 %v2345_v62, %v2131_v55 }
  0xd8   :  { %v738_v42 = vmax.f32 %v722_v45, 0.0  ;;  %v735_v4 = vmax.f32 %v719_v56, 0.0  ;;  %v189_v45 = vld [vmem:[#allocation6 + $0x28] sm:$0xff] }
  0xd9   :  { %v602_v43 = vpop.f32.mrf.mxu2  ;;  %v633_v52 = vpop.f32.mrf.mxu0  ;;  %1275 = vmatpush.bf16.msrb.mxu3 %v2134_v58  ;;  %v203_v2 = vunpack.c.h.bf16 %v189_v45 }
  0xda   :  { %v603_v44 = vadd.f32 %v602_v43, %v205_v32  ;;  %v621_v46 = vpop.f32.mrf.mxu3  ;;  %v652_v53 = vpop.f32.mrf.mxu1  ;;  %v2725_v54 = vpack.c.bf16 %v738_v42, %v734_v41  ;;  %v634_v0 = vadd.f32 %v633_v52, %v194_v47  ;;  %1259 = vmatpush.bf16.msrb.mxu2 %v2046_v15  ;;  %v2027_v32 = vld [vmem:[#allocation9 + $0x108] sm:$0xf0]  ;;  %v705_v42 = vperm.slane %v2694_v49, 3  ;;  %v2335_v49 = vld [vmem:[#allocation9 + $0x184] sm:$0xf] }
  0xdb   :  { %v2030_v39 = vor.u32 %v2319_v31, %v2027_v32  ;;  %v2102_v47 = vor.u32 %v2337_v35, %v2099_v37  ;;  %v2094_v61 = vor.u32 %v2335_v49, %v2091_v59  ;;  %v2352_v31 = vld [vmem:[#allocation11 + $0x8] sm:$0xff]  ;;  %v2365_v35 = vld [vmem:[#allocation11 + $0x70] sm:$0xff] }
  0xdc   :  { %v622_v57 = vadd.f32 %v621_v46, %v603_v44  ;;  %1153 = vmatmul.bf16.gmra.mxu0 %v2725_v54  ;;  %v653_v11 = vadd.f32 %v652_v53, %v634_v0  ;;  %v202_v46 = vunpack.c.l.bf16 %v189_v45 }
  0xdd   :  { %1276 = vmatpush.bf16.msrb.mxu3 %v2126_v7 }
  0xde   :  { %v723_v63 = vadd.f32 %v2707_v33, %v622_v57  ;;  %v712_v27 = vadd.f32 %v2731_v12, %v653_v11  ;;  %1260 = vmatpush.bf16.msrb.mxu2 %v2038_v29  ;;  %v191_v57 = vld [vmem:[#allocation6 + $0x38] sm:$0xff]  ;;  %v2356_v29 = vld [vmem:[#allocation11 + $0x28] sm:$0xff] }
  0xe0   :  { %v739_v5 = vmax.f32 %v723_v63, 0.0  ;;  %v728_v43 = vmax.f32 %v712_v27, 0.0  ;;  %v206_v63 = vunpack.c.l.bf16 %v191_v57 }
  0xe1   :  { %v671_v13 = vpop.f32.mrf.mxu2  ;;  %v635_v16 = vpop.f32.mrf.mxu0  ;;  %1277 = vmatpush.bf16.msrb.mxu3 %v2118_v22 }
  0xe2   :  { %v690_v14 = vpop.f32.mrf.mxu3  ;;  %v2733_v33 = vpack.c.bf16 %v739_v5, %v735_v4  ;;  %v654_v17 = vpop.f32.mrf.mxu1  ;;  %v636_v21 = vadd.f32 %v635_v16, %v198_v6  ;;  %v672_v24 = vadd.f32 %v671_v13, %v195_v8  ;;  %1261 = vmatpush.bf16.msrb.mxu2 %v2030_v39  ;;  %v207_v13 = vunpack.c.h.bf16 %v191_v57  ;;  %v2364_v39 = vld [vmem:[#allocation11 + $0x68] sm:$0xff] }
  0xe4   :  { %1172 = vmatmul.bf16.gmra.mxu1 %v2733_v33  ;;  %v655_v28 = vadd.f32 %v654_v17, %v636_v21  ;;  %v691_v41 = vadd.f32 %v690_v14, %v672_v24 }
  0xe5   :  { %1278 = vmatpush.bf16.msrb.mxu3 %v2110_v50  ;;  %v2366_v50 = vld [vmem:[#allocation11 + $0x78] sm:$0xff] }
  0xe6   :  { %v716_v38 = vadd.f32 %v2731_v12, %v655_v28  ;;  %v713_v55 = vadd.f32 %v705_v42, %v691_v41  ;;  %v2357_v28 = vld [vmem:[#allocation11 + $0x30] sm:$0xff]  ;;  %1455 = vmatpush.bf16.msra.mxu1 %v2366_v50 }
  0xe8   :  { %v732_v36 = vmax.f32 %v716_v38, 0.0  ;;  %v729_v0 = vmax.f32 %v713_v55, 0.0 }
  0xe9   :  { %v673_v40 = vpop.f32.mrf.mxu2  ;;  %v638_v52 = vpop.f32.mrf.mxu0  ;;  %1279 = vmatpush.bf16.msrb.mxu3 %v2102_v47 }
  0xea   :  { %v692_v44 = vpop.f32.mrf.mxu3  ;;  %v674_v51 = vadd.f32 %v673_v40, %v199_v34  ;;  %v657_v53 = vpop.f32.mrf.mxu1  ;;  %v744_v62 = vpack.c.bf16 %v732_v36, %v728_v43  ;;  %v639_v58 = vadd.f32 %v638_v52, %v202_v46  ;;  %v2351_v34 = vld [vmem:[#allocation11] sm:$0xff]  ;;  %1456 = vmatpush.bf16.msra.mxu1 %v2365_v35 }
  0xeb   :  { %v2363_v43 = vld [vmem:[#allocation11 + $0x60] sm:$0xff] }
  0xec   :  { %v693_v56 = vadd.f32 %v692_v44, %v674_v51  ;;  %1224 = vmatmul.bf16.vlgmr.msrb.gmra.mxu0 %v2710_v48  ;;  %1186 = vmatmul.bf16.vlgmr.msra.gmra.mxu2 %v744_v62  ;;  %v658_v3 = vadd.f32 %v657_v53, %v639_v58  ;;  %v2362_v44 = vld [vmem:[#allocation11 + $0x58] sm:$0xff]  ;;  %v2361_v53 = vld [vmem:[#allocation11 + $0x50] sm:$0xff]  ;;  %v2360_v58 = vld [vmem:[#allocation11 + $0x48] sm:$0xff] }
  0xed   :  { %1280 = vmatpush.bf16.msrb.mxu3 %v2094_v61 }
  0xee   :  { %v717_v60 = vadd.f32 %v705_v42, %v693_v56  ;;  %v720_v10 = vadd.f32 %v2731_v12, %v658_v3  ;;  %1457 = vmatpush.bf16.msra.mxu1 %v2364_v39 }
  0xf0   :  { %v733_v1 = vmax.f32 %v717_v60, 0.0  ;;  %v736_v16 = vmax.f32 %v720_v10, 0.0 }
  0xf1   :  { %v676_v4 = vpop.f32.mrf.mxu2  ;;  %v640_v7 = vpop.f32.mrf.mxu0 }
  0xf2   :  { %v695_v5 = vpop.f32.mrf.mxu3  ;;  %v745_v6 = vpack.c.bf16 %v733_v1, %v729_v0  ;;  %v641_v8 = vadd.f32 %v640_v7, %v206_v63  ;;  %v677_v48 = vadd.f32 %v676_v4, %v203_v2  ;;  %v659_v9 = vpop.f32.mrf.mxu1  ;;  %1458 = vmatpush.bf16.msra.mxu1 %v2363_v43  ;;  %v2359_v2 = vld [vmem:[#allocation11 + $0x40] sm:$0xff] }
  0xf4   :  { %1243 = vmatmul.bf16.vlgmr.msrb.gmra.mxu1 %v2719_v18  ;;  %1205 = vmatmul.bf16.vlgmr.msra.gmra.mxu3 %v745_v6  ;;  %v660_v11 = vadd.f32 %v659_v9, %v641_v8  ;;  %v696_v15 = vadd.f32 %v695_v5, %v677_v48 }
  0xf5   :  { %2375 = vmatpush.bf16.msra.mxu3 %v2366_v50 }
  0xf6   :  { %v724_v14 = vadd.f32 %v2731_v12, %v660_v11  ;;  %v721_v24 = vadd.f32 %v705_v42, %v696_v15  ;;  %v2358_v12 = vld [vmem:[#allocation11 + $0x38] sm:$0xff]  ;;  %1459 = vmatpush.bf16.msra.mxu1 %v2362_v44 }
  0xf7   :  { %1436 = vmatpush.bf16.msra.mxu0 %v2358_v12  ;;  %2367 = vmatpush.bf16.msra.mxu2 %v2358_v12 }
  0xf8   :  { %v740_v17 = vmax.f32 %v724_v14, 0.0  ;;  %v737_v26 = vmax.f32 %v721_v24, 0.0 }
  0xf9   :  { %v678_v19 = vpop.f32.mrf.mxu2  ;;  %2376 = vmatpush.bf16.msra.mxu3 %v2365_v35 }
  0xfa   :  { %v679_v20 = vadd.f32 %v678_v19, %v207_v13  ;;  %v697_v21 = vpop.f32.mrf.mxu3  ;;  %v748_v22 = vpack.c.bf16 %v740_v17, %v736_v16  ;;  %1460 = vmatpush.bf16.msra.mxu1 %v2361_v53 }
  0xfb   :  { %1437 = vmatpush.bf16.msra.mxu0 %v2357_v28  ;;  %2368 = vmatpush.bf16.msra.mxu2 %v2357_v28 }
  0xfc   :  { %v698_v25 = vadd.f32 %v697_v21, %v679_v20  ;;  %1229 = vmatmul.bf16.gmra.mxu0 %v2725_v54  ;;  %1191 = vmatmul.bf16.gmra.mxu2 %v748_v22  ;;  %v2355_v54 = vld [vmem:[#allocation11 + $0x20] sm:$0xff] }
  0xfd   :  { %2377 = vmatpush.bf16.msra.mxu3 %v2364_v39 }
  0xfe   :  { %v725_v18 = vadd.f32 %v705_v42, %v698_v25  ;;  %v814_v42 = vld [vmem:[%s2765_s5] sm:$0x3]  ;;  %1461 = vmatpush.bf16.msra.mxu1 %v2360_v58 }
  0xff   :  { %1438 = vmatpush.bf16.msra.mxu0 %v2356_v29  ;;  %2369 = vmatpush.bf16.msra.mxu2 %v2356_v29  ;;  %v816_v36 = vperm.slane %v814_v42, 0  ;;  %v817_v25 = vperm.slane %v814_v42, 1 }
 0x100   :  { %v741_v23 = vmax.f32 %v725_v18, 0.0 }
 0x101   :  { %2378 = vmatpush.bf16.msra.mxu3 %v2363_v43 }
 0x102   :  { %v749_v27 = vpack.c.bf16 %v741_v23, %v737_v26  ;;  %1462 = vmatpush.bf16.msra.mxu1 %v2359_v2 }
 0x103   :  { %1439 = vmatpush.bf16.msra.mxu0 %v2355_v54  ;;  %2370 = vmatpush.bf16.msra.mxu2 %v2355_v54 }
 0x104   :  { %1248 = vmatmul.bf16.gmra.mxu1 %v2733_v33  ;;  %1210 = vmatmul.bf16.gmra.mxu3 %v749_v27  ;;  %v2353_v33 = vld [vmem:[#allocation11 + $0x10] sm:$0xff] }
 0x105   :  { %2379 = vmatpush.bf16.msra.mxu3 %v2362_v44 }
 0x107   :  { %1440 = vmatpush.bf16.msra.mxu0 %v2354_v30  ;;  %2371 = vmatpush.bf16.msra.mxu2 %v2354_v30 }
 0x109   :  { %2380 = vmatpush.bf16.msra.mxu3 %v2361_v53 }
 0x10b   :  { %1441 = vmatpush.bf16.msra.mxu0 %v2353_v33  ;;  %2372 = vmatpush.bf16.msra.mxu2 %v2353_v33 }
 0x10c   :  { %1262 = vmatmul.bf16.vlgmr.msrb.gmra.mxu2 %v744_v62 }
 0x10d   :  { %2381 = vmatpush.bf16.msra.mxu3 %v2360_v58 }
 0x10f   :  { %1442 = vmatpush.bf16.msra.mxu0 %v2352_v31  ;;  %2373 = vmatpush.bf16.msra.mxu2 %v2352_v31 }
 0x111   :  { %2382 = vmatpush.bf16.msra.mxu3 %v2359_v2 }
 0x113   :  { %1443 = vmatpush.bf16.msra.mxu0 %v2351_v34  ;;  %2374 = vmatpush.bf16.msra.mxu2 %v2351_v34 }
 0x114   :  { %1281 = vmatmul.bf16.vlgmr.msrb.gmra.mxu3 %v745_v6 }
 0x11c   :  { %1267 = vmatmul.bf16.gmra.mxu2 %v748_v22 }
 0x124   :  { %1286 = vmatmul.bf16.gmra.mxu3 %v749_v27 }
 0x149   :  { %v1149_v32 = vpop.f32.mrf.mxu0 }
 0x14a   :  { %v1150_v51 = vadd.f32 %v1149_v32, %v816_v36 }
 0x151   :  { %v1168_v45 = vpop.f32.mrf.mxu1  ;;  %v1151_v37 = vpop.f32.mrf.mxu0 }
 0x152   :  { %v1169_v62 = vadd.f32 %v1168_v45, %v1150_v51  ;;  %v1152_v55 = vadd.f32 %v1151_v37, %v816_v36 }
 0x159   :  { %v1170_v38 = vpop.f32.mrf.mxu1  ;;  %v1154_v40 = vpop.f32.mrf.mxu0 }
 0x15a   :  { %v1171_v56 = vadd.f32 %v1170_v38, %v1152_v55  ;;  %v1155_v7 = vadd.f32 %v1154_v40, %v816_v36 }
 0x161   :  { %v1173_v46 = vpop.f32.mrf.mxu1  ;;  %v1156_v60 = vpop.f32.mrf.mxu0 }
 0x162   :  { %v1174_v9 = vadd.f32 %v1173_v46, %v1155_v7  ;;  %v1157_v10 = vadd.f32 %v1156_v60, %v816_v36 }
 0x169   :  { %v1175_v1 = vpop.f32.mrf.mxu1  ;;  %v1225_v48 = vpop.f32.mrf.mxu0 }
 0x16a   :  { %v1176_v13 = vadd.f32 %v1175_v1, %v1157_v10  ;;  %v1226_v27 = vadd.f32 %v1225_v48, %v817_v25 }
 0x16f   :  { %v1187_v41 = vpop.f32.mrf.mxu2 }
 0x170   :  { %v1188_v57 = vadd.f32 %v1187_v41, %v1169_v62 }
 0x171   :  { %v1244_v11 = vpop.f32.mrf.mxu1  ;;  %v1227_v24 = vpop.f32.mrf.mxu0 }
 0x172   :  { %v1245_v28 = vadd.f32 %v1244_v11, %v1226_v27  ;;  %v1228_v29 = vadd.f32 %v1227_v24, %v817_v25  ;;  %v2581_v24 = vmov 0  }
 0x173   :  { %2396 = vset.pattern.permute.xlu2 %v2581_v24  ;;  %2397 = vset.pattern.permute.xlu0 %v2581_v24 }
 0x174   :  { %2398 = vset.pattern.permute.xlu1 %v2581_v24 }
 0x177   :  { %v1206_v47 = vpop.f32.mrf.mxu3  ;;  %v1189_v52 = vpop.f32.mrf.mxu2 }
 0x178   :  { %v1207_v49 = vadd.f32 %v1206_v47, %v1188_v57  ;;  %v1190_v59 = vadd.f32 %v1189_v52, %v1171_v56 }
 0x179   :  { %v1246_v26 = vpop.f32.mrf.mxu1  ;;  %v1230_v33 = vpop.f32.mrf.mxu0 }
 0x17a   :  { %v1292_v3 = vmax.f32 %v1207_v49, 0.0  ;;  %v1247_v54 = vadd.f32 %v1246_v26, %v1228_v29  ;;  %v1231_v43 = vadd.f32 %v1230_v33, %v817_v25 }
 0x17f   :  { %v1208_v61 = vpop.f32.mrf.mxu3  ;;  %v1192_v0 = vpop.f32.mrf.mxu2 }
 0x180   :  { %v1209_v63 = vadd.f32 %v1208_v61, %v1190_v59  ;;  %v1193_v14 = vadd.f32 %v1192_v0, %v1174_v9  ;;  %v2399_v59 = vld [vmem:[%s2767_s7] ss:$0 sm:$0xff]  ;;  %s2582_s7 = smov [#allocation12]  }
 0x181   :  { %v1249_v34 = vpop.f32.mrf.mxu1  ;;  %v1232_v41 = vpop.f32.mrf.mxu0  ;;  %v2400_v0 = vld [vmem:[%s2768_s8] ss:$0 sm:$0xff]  ;;  %s1606_s8 = sshll.u32 %s2582_s7, 4  ;;  %s1607_s8 = int_to_ptr.vmem [resolvable:$true] %s1606_s8 }
 0x182   :  { %v1294_v4 = vmax.f32 %v1209_v63, 0.0  ;;  %v1250_v40 = vadd.f32 %v1249_v34, %v1231_v43  ;;  %v1233_v44 = vadd.f32 %v1232_v41, %v817_v25 }
 0x184   :  { %v1300_v5 = vpack.c.bf16 %v1294_v4, %v1292_v3 }
 0x186   :  { %1444 = vmatmul.bf16.vlgmr.msra.gmra.mxu0 %v1300_v5 }
 0x187   :  { %v1211_v6 = vpop.f32.mrf.mxu3  ;;  %v1194_v8 = vpop.f32.mrf.mxu2 }
 0x188   :  { %v1212_v15 = vadd.f32 %v1211_v6, %v1193_v14  ;;  %v1195_v16 = vadd.f32 %v1194_v8, %v1176_v13 }
 0x189   :  { %v1251_v36 = vpop.f32.mrf.mxu1 }
 0x18a   :  { %v1296_v21 = vmax.f32 %v1212_v15, 0.0  ;;  %v1252_v47 = vadd.f32 %v1251_v36, %v1233_v44 }
 0x18f   :  { %v1213_v17 = vpop.f32.mrf.mxu3  ;;  %v1263_v20 = vpop.f32.mrf.mxu2 }
 0x190   :  { %v1214_v19 = vadd.f32 %v1213_v17, %v1195_v16  ;;  %v1264_v30 = vadd.f32 %v1263_v20, %v1245_v28 }
 0x192   :  { %v1298_v22 = vmax.f32 %v1214_v19, 0.0 }
 0x194   :  { %v1302_v18 = vpack.c.bf16 %v1298_v22, %v1296_v21  ;;  %v2401_v22 = vld [vmem:[#allocation2] ss:$0 sm:$0xff] }
 0x196   :  { %1449 = vmatmul.bf16.vlgmr.msra.gmra.mxu2 %v1302_v18 }
 0x197   :  { %v1282_v23 = vpop.f32.mrf.mxu3  ;;  %v1265_v12 = vpop.f32.mrf.mxu2 }
 0x198   :  { %v1283_v31 = vadd.f32 %v1282_v23, %v1264_v30  ;;  %v1266_v32 = vadd.f32 %v1265_v12, %v1247_v54 }
 0x19a   :  { %v1293_v37 = vmax.f32 %v1283_v31, 0.0 }
 0x19f   :  { %v1284_v45 = vpop.f32.mrf.mxu3  ;;  %v1268_v35 = vpop.f32.mrf.mxu2 }
 0x1a0   :  { %v1285_v50 = vadd.f32 %v1284_v45, %v1266_v32  ;;  %v1269_v51 = vadd.f32 %v1268_v35, %v1250_v40 }
 0x1a2   :  { %v1295_v38 = vmax.f32 %v1285_v50, 0.0 }
 0x1a4   :  { %v1301_v39 = vpack.c.bf16 %v1295_v38, %v1293_v37 }
 0x1a6   :  { %1463 = vmatmul.bf16.vlgmr.msra.gmra.mxu1 %v1301_v39 }
 0x1a7   :  { %v1287_v42 = vpop.f32.mrf.mxu3  ;;  %v1270_v46 = vpop.f32.mrf.mxu2 }
 0x1a8   :  { %v1288_v52 = vadd.f32 %v1287_v42, %v1269_v51  ;;  %v1271_v53 = vadd.f32 %v1270_v46, %v1252_v47 }
 0x1aa   :  { %v1297_v56 = vmax.f32 %v1288_v52, 0.0 }
 0x1af   :  { %v1289_v62 = vpop.f32.mrf.mxu3 }
 0x1b0   :  { %v1290_v55 = vadd.f32 %v1289_v62, %v1271_v53 }
 0x1b2   :  { %v1299_v57 = vmax.f32 %v1290_v55, 0.0 }
 0x1b4   :  { %v1303_v58 = vpack.c.bf16 %v1299_v57, %v1297_v56 }
 0x1b6   :  { %1468 = vmatmul.bf16.vlgmr.msra.gmra.mxu3 %v1303_v58 }
 0x203   :  { %v1445_v49 = vpop.f32.mrf.mxu0 }
 0x204   :  { %v1446_v60 = vadd.f32 %v2399_v59, %v1445_v49 }
 0x20b   :  { %v1447_v2 = vpop.f32.mrf.mxu0 }
 0x20c   :  { %v1448_v4 = vadd.f32 %v2399_v59, %v1447_v2 }
 0x219   :  { %v1450_v48 = vpop.f32.mrf.mxu2 }
 0x21a   :  { %v1451_v9 = vadd.f32 %v2399_v59, %v1450_v48 }
 0x221   :  { %v1452_v14 = vpop.f32.mrf.mxu2 }
 0x222   :  { %v1453_v16 = vadd.f32 %v2399_v59, %v1452_v14 }
 0x223   :  { %v1464_v61 = vpop.f32.mrf.mxu1 }
 0x224   :  { %v1465_v63 = vadd.f32 %v1464_v61, %v1446_v60 }
 0x226   :  { %v1474_v1 = vmax.f32 %v1465_v63, 0.0 }
 0x228   :  { %v1482_v3 = vmul.f32 %v2400_v0, %v1474_v1 }
 0x22a   :  { %1486 = vadd.xlane.f32.xlu0 %v1482_v3 }
 0x22b   :  { %v1466_v5 = vpop.f32.mrf.mxu1 }
 0x22c   :  { %v1467_v6 = vadd.f32 %v1466_v5, %v1448_v4 }
 0x22e   :  { %v1475_v7 = vmax.f32 %v1467_v6, 0.0 }
 0x230   :  { %v1483_v8 = vmul.f32 %v2400_v0, %v1475_v7 }
 0x232   :  { %1488 = vadd.xlane.f32.xlu0 %v1483_v8 }
 0x239   :  { %v1469_v10 = vpop.f32.mrf.mxu3 }
 0x23a   :  { %v1470_v11 = vadd.f32 %v1469_v10, %v1451_v9 }
 0x23c   :  { %v1476_v13 = vmax.f32 %v1470_v11, 0.0 }
 0x23e   :  { %v1484_v15 = vmul.f32 %v2400_v0, %v1476_v13 }
 0x240   :  { %1490 = vadd.xlane.f32.xlu1 %v1484_v15 }
 0x241   :  { %v1471_v17 = vpop.f32.mrf.mxu3 }
 0x242   :  { %v1472_v19 = vadd.f32 %v1471_v17, %v1453_v16 }
 0x244   :  { %v1477_v20 = vmax.f32 %v1472_v19, 0.0 }
 0x246   :  { %v1485_v21 = vmul.f32 %v2400_v0, %v1477_v20 }
 0x248   :  { %1492 = vadd.xlane.f32.xlu1 %v1485_v21 }
 0x29d   :  { %v1487_v25 = vpop.xlane.xlu0 %1486 }
 0x29e   :  { %v1498_v18 = vadd.f32 %v2401_v22, %v1487_v25 }
 0x2a0   :  { %v2215_v26 = vmul.f32 -1.442695, %v1498_v18 }
 0x2a2   :  { %2402 = vpow2.f32 %v2215_v26 }
 0x2a5   :  { %v1489_v23 = vpop.xlane.xlu0 %1488 }
 0x2a6   :  { %v1499_v27 = vadd.f32 %v2401_v22, %v1489_v23 }
 0x2a8   :  { %v2403_v12 = vpop.eup %2402  ;;  %v2216_v28 = vmul.f32 -1.442695, %v1499_v27 }
 0x2a9   :  { %v1514_v29 = vadd.f32 1.0, %v2403_v12 }
 0x2aa   :  { %2404 = vpow2.f32 %v2216_v28 }
 0x2ab   :  { %2406 = vrcp.f32 %v1514_v29  ;;  %v1529_v50 = vand.u32 2147483648, %v1514_v29  ;;  %v1527_v38 = vand.u32 2147483647, %v1514_v29  ;;  %vm1523_vm1 = vweird.f32 %v1514_v29 }
 0x2ad   :  { %v1530_v42 = vor.u32 1.1754944e-38, %v1529_v50  ;;  %vm1528_vm3 = vcmp.eq.f32.partialorder %v1527_v38, 8.507059e+37 }
 0x2b0   :  { %v2405_v54 = vpop.eup %2404 }
 0x2b1   :  { %v2407_v30 = vpop.eup %2406  ;;  %v1515_v33 = vadd.f32 1.0, %v2405_v54 }
 0x2b2   :  { %v1519_v31 = vmul.f32 %v2407_v30, %v1514_v29  ;;  %vm1524_vm0 = vweird.f32 %v2407_v30 }
 0x2b3   :  { %2408 = vrcp.f32 %v1515_v33  ;;  %v1491_v32 = vpop.xlane.xlu1 %1490  ;;  %vm1525_vm2 = vmor %vm1523_vm1, %vm1524_vm0  ;;  %v1544_v51 = vand.u32 2147483648, %v1515_v33  ;;  %v1542_v55 = vand.u32 2147483647, %v1515_v33  ;;  %vm1538_vm5 = vweird.f32 %v1515_v33 }
 0x2b4   :  { %v1500_v34 = vadd.f32 %v2401_v22, %v1491_v32  ;;  %v1520_v45 = vsub.f32 1.0, %v1519_v31 }
 0x2b5   :  { %v1545_v58 = vor.u32 1.1754944e-38, %v1544_v51  ;;  %vm1543_vm7 = vcmp.eq.f32.partialorder %v1542_v55, 8.507059e+37 }
 0x2b6   :  { %v2217_v35 = vmul.f32 -1.442695, %v1500_v34  ;;  %v1521_v37 = vmul.f32 %v2407_v30, %v1520_v45 }
 0x2b8   :  { %2410 = vpow2.f32 %v2217_v35  ;;  %v1522_v39 = vadd.f32 %v2407_v30, %v1521_v37 }
 0x2b9   :  { %v2409_v41 = vpop.eup %2408 }
 0x2ba   :  { %v1526_v43 = vsel %vm1525_vm2, %v2407_v30, %v1522_v39  ;;  %v1534_v36 = vmul.f32 %v2409_v41, %v1515_v33  ;;  %vm1539_vm4 = vweird.f32 %v2409_v41 }
 0x2bb   :  { %v1493_v40 = vpop.xlane.xlu1 %1492  ;;  %v1531_v44 = vsel %vm1528_vm3, %v1530_v42, %v1526_v43  ;;  %vm1540_vm6 = vmor %vm1538_vm5, %vm1539_vm4 }
 0x2bc   :  { %v1501_v46 = vadd.f32 %v2401_v22, %v1493_v40  ;;  %1580 = vperm.xlu2 %2396, %v1531_v44   ;;  %v1535_v47 = vsub.f32 1.0, %v1534_v36 }
 0x2be   :  { %v2411_v52 = vpop.eup %2410  ;;  %v2218_v53 = vmul.f32 -1.442695, %v1501_v46  ;;  %v1536_v62 = vmul.f32 %v2409_v41, %v1535_v47 }
 0x2bf   :  { %v1516_v56 = vadd.f32 1.0, %v2411_v52 }
 0x2c0   :  { %2412 = vpow2.f32 %v2218_v53  ;;  %v1537_v57 = vadd.f32 %v2409_v41, %v1536_v62 }
 0x2c1   :  { %2414 = vrcp.f32 %v1516_v56  ;;  %v1559_v2 = vand.u32 2147483648, %v1516_v56  ;;  %v1557_v4 = vand.u32 2147483647, %v1516_v56  ;;  %vm1553_vm9 = vweird.f32 %v1516_v56 }
 0x2c2   :  { %v1541_v49 = vsel %vm1540_vm6, %v2409_v41, %v1537_v57 }
 0x2c3   :  { %v1546_v59 = vsel %vm1543_vm7, %v1545_v58, %v1541_v49  ;;  %v1560_v7 = vor.u32 1.1754944e-38, %v1559_v2  ;;  %vm1558_vm11 = vcmp.eq.f32.partialorder %v1557_v4, 8.507059e+37 }
 0x2c4   :  { %1585 = vperm.xlu2 %2396, %v1546_v59  }
 0x2c6   :  { %v2413_v60 = vpop.eup %2412 }
 0x2c7   :  { %v2415_v61 = vpop.eup %2414  ;;  %v1517_v63 = vadd.f32 1.0, %v2413_v60 }
 0x2c8   :  { %v1549_v0 = vmul.f32 %v2415_v61, %v1516_v56  ;;  %vm1554_vm8 = vweird.f32 %v2415_v61 }
 0x2c9   :  { %2416 = vrcp.f32 %v1517_v63  ;;  %vm1555_vm10 = vmor %vm1553_vm9, %vm1554_vm8  ;;  %v1574_v11 = vand.u32 2147483648, %v1517_v63  ;;  %v1572_v14 = vand.u32 2147483647, %v1517_v63  ;;  %vm1568_vm13 = vweird.f32 %v1517_v63 }
 0x2ca   :  { %v1550_v1 = vsub.f32 1.0, %v1549_v0 }
 0x2cb   :  { %v1575_v16 = vor.u32 1.1754944e-38, %v1574_v11  ;;  %vm1573_vm15 = vcmp.eq.f32.partialorder %v1572_v14, 8.507059e+37 }
 0x2cc   :  { %v1551_v3 = vmul.f32 %v2415_v61, %v1550_v1 }
 0x2ce   :  { %v1552_v5 = vadd.f32 %v2415_v61, %v1551_v3 }
 0x2cf   :  { %v2417_v6 = vpop.eup %2416 }
 0x2d0   :  { %v1556_v8 = vsel %vm1555_vm10, %v2415_v61, %v1552_v5  ;;  %v1564_v48 = vmul.f32 %v2417_v6, %v1517_v63  ;;  %vm1569_vm12 = vweird.f32 %v2417_v6 }
 0x2d1   :  { %v1561_v9 = vsel %vm1558_vm11, %v1560_v7, %v1556_v8  ;;  %vm1570_vm14 = vmor %vm1568_vm13, %vm1569_vm12 }
 0x2d2   :  { %1590 = vperm.xlu0 %2397, %v1561_v9   ;;  %v1565_v10 = vsub.f32 1.0, %v1564_v48 }
 0x2d4   :  { %v1566_v13 = vmul.f32 %v2417_v6, %v1565_v10 }
 0x2d6   :  { %v1567_v15 = vadd.f32 %v2417_v6, %v1566_v13 }
 0x2d8   :  { %v1571_v17 = vsel %vm1570_vm14, %v2417_v6, %v1567_v15 }
 0x2d9   :  { %v1576_v19 = vsel %vm1573_vm15, %v1575_v16, %v1571_v17 }
 0x2da   :  { %1595 = vperm.xlu1 %2398, %v1576_v19  }
 0x316   :  { %v1581_v20 = vpop.permute.xlu2 %1580 }
 0x317   :  { %1598 = vst [vmem:[#allocation12] sm:$0xff] %v1581_v20 }
 0x31e   :  { %v1586_v21 = vpop.permute.xlu2 %1585 }
 0x31f   :  { %1599 = vst [vmem:[#allocation12 + $0x8] sm:$0xff] %v1586_v21 }
 0x344   :  { %v1591_v22 = vpop.permute.xlu0 %1590 }
 0x345   :  { %1600 = vst [vmem:[#allocation12 + $0x10] sm:$0xff] %v1591_v22 }
 0x34c   :  { %v1596_v24 = vpop.permute.xlu1 %1595 }
 0x34d   :  { %1601 = vst [vmem:[#allocation12 + $0x18] sm:$0xff] %v1596_v24 }
 0x34e   :  { %1614 = dma.vmem_to_hbm [thread:$0]  %s1607_s8, 512, %s1609_s27, [#allocation5], %s2574_s1, %s2574_s1, %s2575_s29  }
 0x34f   :  { %2568 = dma.done.wait [#allocation5], 512  }
 0x350   :  { %2569 = vsyncadd [#allocation5], 4294966784 }
 0x351   :  { %1619 = vsyncpa [#allocation4], 1 }
 0x352   :  { %1620 = vsyncpa [#allocation7], 1 }
 0x353   :  { %1621 = vsyncpa [#allocation10], 1 }
 0x354   :  { %1622 = vsyncpa [#allocation5], 1 }

</bundles_post_ra>
